<compile_context>
chip_gen: v6e
topology: v6e:2x2x1
jax: 0.10.0
libtpu: 0.0.40
codegen_flags: <defaults>
</compile_context>

<pallas_src>
import math
import jax
import jax.numpy as jnp
from jax.experimental import pallas as pl
from jax.experimental.pallas import tpu as pltpu


# ----------------------------- Pallas kernel -------------------------------

def _fused_kernel(b_blk, s_pad, seq_l, d, heads, dh, out_pad, eps):
    """Whole MAEDecoder forward (minus argsort bookkeeping) for one row-stacked
    block of `b_blk` batch elements.

    Sequence layout per batch element (s_pad rows, cls LAST so all per-batch
    row slices start at multiples of 8):
      rows 0..L-1 : all patch tokens (original order)
      row  L      : cls token
      rows > L    : zero padding
    Non-kept tokens and pad rows are excluded from the attention key set via
    `keyrow`; their (garbage but finite) outputs are replaced by the mask token
    in the epilogue select, which reproduces the reference gather/scatter.
    """
    k_chunks = d // seq_l   # flat (L, D) buffer reinterpreted as (D, L): D = k_chunks * L

    def kernel(patch_ref, keyrow_ref, selrow_ref,
               poscls_ref, norms_ref, wconv_ref,
               wqkv_ref, bqkv_ref, wo_ref, bo_ref,
               wfc1_ref, bfc1_ref, wfc2_ref, bfc2_ref,
               wproj_ref, mt_ref, wdec_ref, bdec_ref, o_ref):
        f32, bf16 = jnp.float32, jnp.bfloat16
        m_rows = b_blk * s_pad

        def ln(x, gi, bi):                        # f32 layernorm over last dim
            g = norms_ref[gi:gi + 1, :].astype(f32)
            b = norms_ref[bi:bi + 1, :].astype(f32)
            mu = jnp.mean(x, axis=-1, keepdims=True)
            var = jnp.mean(jnp.square(x - mu), axis=-1, keepdims=True)
            return (x - mu) * jax.lax.rsqrt(var + eps) * g + b

        def mm(a, w_ref, b_row=None):             # bf16 MXU matmul, f32 accum
            y = jnp.dot(a.astype(bf16), w_ref[...], preferred_element_type=f32)
            if b_row is not None:
                y = y + b_row
            return y

        # ---- patch embed (conv1 as matmul) + positional / cls rows
        pos = poscls_ref[...].astype(f32)                     # (s_pad, D)
        if b_blk > 1:
            pos = jnp.tile(pos, (b_blk, 1))                   # row-stacked batches
        x = mm(patch_ref[0], wconv_ref) + pos                 # (M, D)

        # ---- ln_pre
        x = ln(x, 0, 1)

        # ---- residual attention block (pre-norm, CLIP-style)
        h = ln(x, 2, 3)
        qkv = mm(h, wqkv_ref, bqkv_ref[...].astype(f32))      # (M, 3D), q scale folded
        q, k, v = qkv[:, :d], qkv[:, d:2 * d], qkv[:, 2 * d:]

        keyflat = keyrow_ref[0].astype(f32)                   # (1, M) {0,1}
        valid = keyflat > 0.5                                 # key mask, bcast over rows
        if b_blk > 1:                                         # block-diagonal across batches
            ri = jax.lax.broadcasted_iota(jnp.int32, (m_rows, m_rows), 0) // s_pad
            ci = jax.lax.broadcasted_iota(jnp.int32, (m_rows, m_rows), 1) // s_pad
            valid = jnp.logical_and(valid, ri == ci)

        # NOTE: heads == 1 at D=64; for larger D pack heads into one dot_general.
        head_outs = []
        for hh in range(heads):
            sl = slice(hh * dh, (hh + 1) * dh)
            qh, kh, vh = q[:, sl], k[:, sl], v[:, sl]
            s = jax.lax.dot_general(qh.astype(bf16), kh.astype(bf16),
                                    (((1,), (1,)), ((), ())),
                                    preferred_element_type=f32)
            s = jnp.where(valid, s, -1e30)
            s = s - jnp.max(s, axis=-1, keepdims=True)
            p = jnp.exp(s)
            denom = jnp.sum(p, axis=-1, keepdims=True)
            p = p * pl.reciprocal(denom, approx=True)          # EUP, not VPU divide
            head_outs.append(jnp.dot(p.astype(bf16), vh.astype(bf16),
                                     preferred_element_type=f32))
        a = head_outs[0] if heads == 1 else jnp.concatenate(head_outs, axis=-1)
        x = x + mm(a, wo_ref, bo_ref[...].astype(f32))

        # ---- residual MLP (tanh GELU -> EUP slot, free filler here)
        h = ln(x, 4, 5)
        h = mm(h, wfc1_ref, bfc1_ref[...].astype(f32))
        h = jax.nn.gelu(h, approximate=True)
        h = mm(h, wfc2_ref, bfc2_ref[...].astype(f32))
        x = x + h

        # ---- ln_post + projection (no bias)
        x = ln(x, 6, 7)
        x = mm(x, wproj_ref)                                   # (M, D)

        # ---- epilogue per batch element: mask-token select + fused decoder
        # (conv1x1 + PixelShuffle + patchify + the reference's flat (L,D)->(D,L)
        # buffer reinterpretation, as k_chunks transposed-LHS matmuls).
        mt = mt_ref[...].astype(f32)                           # (1, D)
        bdec = bdec_ref[...].astype(f32)                       # (1, out_pad)
        preds = []
        for b in range(b_blk):
            enc = x[b * s_pad:b * s_pad + seq_l, :]            # (L, D) patch-token rows
            sel = selrow_ref[0][b * seq_l:(b + 1) * seq_l, :].astype(f32)   # (L, 1)
            tok = mt + sel * (enc - mt)                        # masked rows -> mask token
            y = bdec
            for qc in range(k_chunks):
                s_q = tok[:, qc * seq_l:(qc + 1) * seq_l].astype(bf16)      # (L, L)
                w_q = wdec_ref[qc * seq_l:(qc + 1) * seq_l, :]              # (L, out_pad)
                y = y + jax.lax.dot_general(s_q, w_q, (((0,), (0,)), ((), ())),
                                            preferred_element_type=f32)
            preds.append(y)
        out = preds[0] if b_blk == 1 else jnp.concatenate(preds, axis=0)
        o_ref[0] = out.astype(o_ref.dtype)                     # lane-dense (B*L, 128)

    return kernel


# --------------------------- parameters (synthetic) -------------------------

def init_params(key, D=64, p=4, H=16, W=16):
    """Torch-layout parameters for a CLIP-style visual encoder (1 residual
    attention block) + the MAEDecoder head.  Deterministic."""
    num_y, num_x = H // p, W // p
    L = num_y * num_x
    heads = max(1, D // 64)
    s = 0.02
    ks = jax.random.split(key, 9)
    f32 = jnp.float32
    return dict(
        D=D, patch_size=p, heads=heads, num_y=num_y, num_x=num_x,
        conv1_w=s * jax.random.normal(ks[0], (D, 3, p, p), f32),      # no bias
        class_emb=s * jax.random.normal(ks[1], (D,), f32),
        pos_emb=s * jax.random.normal(ks[2], (L + 1, D), f32),
        ln_pre_g=jnp.ones((D,), f32), ln_pre_b=jnp.zeros((D,), f32),
        ln1_g=jnp.ones((D,), f32), ln1_b=jnp.zeros((D,), f32),
        attn_in_w=s * jax.random.normal(ks[3], (3 * D, D), f32),
        attn_in_b=jnp.zeros((3 * D,), f32),
        attn_out_w=s * jax.random.normal(ks[4], (D, D), f32),
        attn_out_b=jnp.zeros((D,), f32),
        ln2_g=jnp.ones((D,), f32), ln2_b=jnp.zeros((D,), f32),
        fc1_w=s * jax.random.normal(ks[5], (4 * D, D), f32),
        fc1_b=jnp.zeros((4 * D,), f32),
        fc2_w=s * jax.random.normal(ks[6], (D, 4 * D), f32),
        fc2_b=jnp.zeros((D,), f32),
        ln_post_g=jnp.ones((D,), f32), ln_post_b=jnp.zeros((D,), f32),
        proj=s * jax.random.normal(ks[7], (D, D), f32),
        # MAEDecoder
        mask_token=jnp.zeros((1, 1, D), f32),
        dec_w=s * jax.random.normal(ks[8], (p * p * 3, D, 1, 1), f32),  # 1x1 conv
        dec_b=jnp.zeros((p * p * 3,), f32),
    )


def prepare_weights(params):
    """One-time prep: (K, N) matmul layout, bf16 casts, 1/sqrt(Dh) folded into
    the q slice of the fused QKV weight, layernorm vectors stacked, pos+cls
    rows prebuilt, and the decoder conv pre-permuted / chunk-reordered /
    lane-padded so conv + PixelShuffle + patchify + the (L,D)->(D,L) buffer
    reinterpretation become k = D//L transposed matmuls with a 128-wide output."""
    f32, bf16 = jnp.float32, jnp.bfloat16
    D = params["D"]
    p = params["patch_size"]
    heads = params["heads"]
    num_y, num_x = params["num_y"], params["num_x"]
    L = num_y * num_x
    S_PAD = ((L + 1 + 7) // 8) * 8            # patch tokens + cls, padded to x8
    Dh = D // heads
    scale = 1.0 / math.sqrt(Dh)
    out_c = p * p * 3
    out_pad = ((out_c + 127) // 128) * 128
    # TODO(synk): the fused decoder reinterpret assumes EMBED_DIM % (num_y*num_x) == 0.
    assert D % L == 0, "decoder buffer-reinterpret fusion needs D % (num_y*num_x) == 0"

    w_in, b_in = params["attn_in_w"], params["attn_in_b"]
    wqkv = jnp.concatenate([w_in[:D, :].T * scale,            # q (scale folded)
                            w_in[D:2 * D, :].T,               # k
                            w_in[2 * D:, :].T], axis=1).astype(bf16)       # (D, 3D)
    bqkv = jnp.concatenate([b_in[:D] * scale, b_in[D:2 * D],
                            b_in[2 * D:]])[None, :].astype(f32)            # (1, 3D)

    # pos + cls rows (patch tokens rows 0..L-1, cls row L, zero pads)
    poscls = jnp.zeros((S_PAD, D), f32)
    poscls = poscls.at[:L, :].set(params["pos_emb"][1:L + 1])
    poscls = poscls.at[L, :].set(params["class_emb"] + params["pos_emb"][0])

    # decoder: pred[n, l, j] = sum_d W[o(j), d] * chan[n, d, l] + b[o(j)]
    # with o(j) = (j % 3)*p*p + j // 3 (PixelShuffle + patchify permutation)
    # and chan the flat reinterpretation of the (L, D) token buffer as (D, L):
    # chan[d = k*a + q, l] = tokens[a, q*L + l]  (k = D // L).
    w2d = params["dec_w"].reshape(out_c, D)
    j = jnp.arange(out_c)
    perm = (j % 3) * (p * p) + (j // 3)
    wperm_t = w2d[perm].T                                      # (D, out_c)
    wdec_pad = jnp.zeros((D, out_pad), f32).at[:, :out_c].set(wperm_t)
    kc = D // L
    wdec_stack = (wdec_pad.reshape(L, kc, out_pad)             # rows d = a*kc + q
                  .transpose(1, 0, 2)                          # -> [q, a, :]
                  .reshape(D, out_pad).astype(bf16))
    bdec_pad = jnp.zeros((1, out_pad), f32).at[:, :out_c].set(params["dec_b"][perm])

    return dict(
        D=D, p=p, heads=heads, Dh=Dh, num_y=num_y, num_x=num_x,
        L=L, S_PAD=S_PAD, out_c=out_c, out_pad=out_pad,
        poscls=poscls,
        norms=jnp.stack([params["ln_pre_g"], params["ln_pre_b"],
                         params["ln1_g"], params["ln1_b"],
                         params["ln2_g"], params["ln2_b"],
                         params["ln_post_g"], params["ln_post_b"]], 0).astype(f32),
        wconv=params["conv1_w"].reshape(D, 3 * p * p).T.astype(bf16),
        wqkv=wqkv, bqkv=bqkv,
        wo=params["attn_out_w"].T.astype(bf16),
        bo=params["attn_out_b"][None, :].astype(f32),
        wfc1=params["fc1_w"].T.astype(bf16),
        bfc1=params["fc1_b"][None, :].astype(f32),
        wfc2=params["fc2_w"].T.astype(bf16),
        bfc2=params["fc2_b"][None, :].astype(f32),
        wproj=params["proj"].astype(bf16),
        mask_token=params["mask_token"].reshape(1, D).astype(f32),
        wdec_stack=wdec_stack, bdec_pad=bdec_pad,
    )


# -------------------------------- forward -----------------------------------

def patchify(imgs, p):
    """imgs: (N, 3, H, W) -> (N, L, p*p*3), matching MAEDecoder.patchify."""
    N, _, H, W = imgs.shape
    h, w = H // p, W // p
    x = imgs.reshape(N, 3, h, p, w, p)
    x = jnp.einsum("nchpwq->nhwpqc", x)
    return x.reshape(N, h * w, p * p * 3)


def mae_decoder_forward(prep, imgs, mask_ratio, mask_key):
    N = imgs.shape[0]
    D, p = prep["D"], prep["p"]
    heads, Dh = prep["heads"], prep["Dh"]
    num_y, num_x = prep["num_y"], prep["num_x"]
    L, S_PAD = prep["L"], prep["S_PAD"]
    PP3 = 3 * p * p
    out_c, out_pad = prep["out_c"], prep["out_pad"]
    f32 = jnp.float32

    len_keep = int(L * (1 - mask_ratio))

    # Batch row-stacking: at most 2 "parallel" grid steps (both TCs on v7x);
    # each step processes B_BLK batch elements stacked along the sublane axis.
    G = 2 if (N >= 2 and N % 2 == 0) else 1
    B_BLK = N // G

    # ---- random_masking bookkeeping (argsort has no Pallas equivalent; tiny)
    noise = jax.random.uniform(mask_key, (N, L))
    ids_shuffle = jnp.argsort(noise, axis=1)
    ids_restore = jnp.argsort(ids_shuffle, axis=1)
    mask = (ids_restore >= len_keep).astype(imgs.dtype)          # (N, L), 1 = masked
    kept = (1.0 - mask).astype(f32)

    # ---- conv-ordered patches for ALL tokens (no gather: non-kept tokens are
    # excluded from the attention key set and replaced by the mask token
    # inside the kernel — row-wise ops are token-independent, so kept-token
    # outputs match the reference's shuffled/truncated sequence).
    patches = imgs.reshape(N, 3, num_y, p, num_x, p)
    patches = jnp.transpose(patches, (0, 2, 4, 1, 3, 5)).reshape(N, L, PP3)
    patches = jnp.concatenate(
        [patches.astype(f32), jnp.zeros((N, S_PAD - L, PP3), f32)], axis=1)
    patches = patches.reshape(G, B_BLK * S_PAD, PP3)

    # key validity per token column: kept patch tokens + cls (row L); pads 0.
    keyrow = jnp.concatenate([kept, jnp.ones((N, 1), f32),
                              jnp.zeros((N, S_PAD - L - 1), f32)], axis=1)
    keyrow = keyrow.reshape(G, 1, B_BLK * S_PAD)
    selrow = kept.reshape(G, B_BLK * L, 1)

    kernel = _fused_kernel(B_BLK, S_PAD, L, D, heads, Dh, out_pad, 1e-5)

    def wspec(shape):                     # weights: same block every grid step
        nd = len(shape)
        return pl.BlockSpec(shape, lambda g: (0,) * nd)

    pred_pad = pl.pallas_call(
        kernel,
        out_shape=jax.ShapeDtypeStruct((G, B_BLK * L, out_pad), f32),
        grid=(G,),
        in_specs=[
            pl.BlockSpec((1, B_BLK * S_PAD, PP3), lambda g: (g, 0, 0)),   # patches
            pl.BlockSpec((1, 1, B_BLK * S_PAD), lambda g: (g, 0, 0)),     # key mask
            pl.BlockSpec((1, B_BLK * L, 1), lambda g: (g, 0, 0)),         # keep select
            wspec((S_PAD, D)),        # pos + cls rows
            wspec((8, D)),            # layernorm g/b stack
            wspec((PP3, D)),          # conv1 weight
            wspec((D, 3 * D)),        # fused qkv weight (q scale folded)
            wspec((1, 3 * D)),        # fused qkv bias
            wspec((D, D)),            # wo
            wspec((1, D)),            # bo
            wspec((D, 4 * D)),        # wfc1
            wspec((1, 4 * D)),        # bfc1
            wspec((4 * D, D)),        # wfc2
            wspec((1, D)),            # bfc2
            wspec((D, D)),            # wproj
            wspec((1, D)),            # mask token
            wspec((D, out_pad)),      # decoder weight (permuted/reordered/padded)
            wspec((1, out_pad)),      # decoder bias (permuted/padded)
        ],
        out_specs=pl.BlockSpec((1, B_BLK * L, out_pad), lambda g: (g, 0, 0)),
        compiler_params=pltpu.CompilerParams(dimension_semantics=("parallel",)),
    )(patches, keyrow, selrow,
      prep["poscls"], prep["norms"], prep["wconv"],
      prep["wqkv"], prep["bqkv"], prep["wo"], prep["bo"],
      prep["wfc1"], prep["bfc1"], prep["wfc2"], prep["bfc2"],
      prep["wproj"], prep["mask_token"], prep["wdec_stack"], prep["bdec_pad"])

    # TODO(synk): cross_attn path (text_embs != None) not exercised; the
    # default forward(imgs, mask_ratio) call skips nn.MultiheadAttention.

    pred = pred_pad.reshape(N, L, out_pad)[:, :, :out_c]          # (N, L, p*p*3)
    imgs_p = patchify(imgs, p)
    return imgs_p, pred, mask


# ---------------------------------- main ------------------------------------

if __name__ == "__main__":
    key = jax.random.PRNGKey(0)
    k_params, k_imgs, k_mask = jax.random.split(key, 3)

    D, p, H, W, N = 64, 4, 16, 16, 2          # EMBED_DIM=64, STRIDE=4, 16x16 imgs
    params = init_params(k_params, D=D, p=p, H=H, W=W)
    prep = prepare_weights(params)
    imgs = jax.random.normal(k_imgs, (N, 3, H, W), jnp.float32)

    fwd = jax.jit(lambda im, mk: mae_decoder_forward(prep, im, 0.25, mk))
    imgs_patch, pred, mask = fwd(imgs, k_mask)
    jax.block_until_ready((imgs_patch, pred, mask))

    L = (H // p) * (W // p)
    assert imgs_patch.shape == (N, L, p * p * 3)
    assert pred.shape == (N, L, p * p * 3)
    assert mask.shape == (N, L)
    assert bool(jnp.isfinite(pred).all())
    assert bool(jnp.isfinite(mask).all())
    print("KERNEL_OK")
</pallas_src>

<mosaic_0001>
module attributes {stable_mosaic.version = 11 : i64} {
  func.func @kernel(%arg0: i32, %arg1: memref<1x24x48xf32, #tpu.memory_space<vmem>>, %arg2: memref<1x1x24xf32, #tpu.memory_space<vmem>>, %arg3: memref<1x16x1xf32, #tpu.memory_space<vmem>>, %arg4: memref<24x64xf32, #tpu.memory_space<vmem>>, %arg5: memref<8x64xf32, #tpu.memory_space<vmem>>, %arg6: memref<48x64xbf16, #tpu.memory_space<vmem>>, %arg7: memref<64x192xbf16, #tpu.memory_space<vmem>>, %arg8: memref<1x192xf32, #tpu.memory_space<vmem>>, %arg9: memref<64x64xbf16, #tpu.memory_space<vmem>>, %arg10: memref<1x64xf32, #tpu.memory_space<vmem>>, %arg11: memref<64x256xbf16, #tpu.memory_space<vmem>>, %arg12: memref<1x256xf32, #tpu.memory_space<vmem>>, %arg13: memref<256x64xbf16, #tpu.memory_space<vmem>>, %arg14: memref<1x64xf32, #tpu.memory_space<vmem>>, %arg15: memref<64x64xbf16, #tpu.memory_space<vmem>>, %arg16: memref<1x64xf32, #tpu.memory_space<vmem>>, %arg17: memref<64x128xbf16, #tpu.memory_space<vmem>>, %arg18: memref<1x128xf32, #tpu.memory_space<vmem>>, %arg19: memref<1x16x128xf32, #tpu.memory_space<vmem>>) attributes {dimension_semantics = [#tpu.dimension_semantics<parallel>], iteration_bounds = array<i64: 2>, scalar_prefetch = 0 : i64, scratch_operands = 0 : i64, tpu.core_type = #tpu.core_type<tc>, window_params = [{transform_indices = @transform_0, window_bounds = array<i64: 1, 24, 48>}, {transform_indices = @transform_1, window_bounds = array<i64: 1, 1, 24>}, {transform_indices = @transform_2, window_bounds = array<i64: 1, 16, 1>}, {pipeline_mode = #tpu.pipeline_mode<synchronous>, transform_indices = @transform_3, window_bounds = array<i64: 24, 64>}, {pipeline_mode = #tpu.pipeline_mode<synchronous>, transform_indices = @transform_4, window_bounds = array<i64: 8, 64>}, {pipeline_mode = #tpu.pipeline_mode<synchronous>, transform_indices = @transform_5, window_bounds = array<i64: 48, 64>}, {pipeline_mode = #tpu.pipeline_mode<synchronous>, transform_indices = @transform_6, window_bounds = array<i64: 64, 192>}, {pipeline_mode = #tpu.pipeline_mode<synchronous>, transform_indices = @transform_7, window_bounds = array<i64: 1, 192>}, {pipeline_mode = #tpu.pipeline_mode<synchronous>, transform_indices = @transform_8, window_bounds = array<i64: 64, 64>}, {pipeline_mode = #tpu.pipeline_mode<synchronous>, transform_indices = @transform_9, window_bounds = array<i64: 1, 64>}, {pipeline_mode = #tpu.pipeline_mode<synchronous>, transform_indices = @transform_10, window_bounds = array<i64: 64, 256>}, {pipeline_mode = #tpu.pipeline_mode<synchronous>, transform_indices = @transform_11, window_bounds = array<i64: 1, 256>}, {pipeline_mode = #tpu.pipeline_mode<synchronous>, transform_indices = @transform_12, window_bounds = array<i64: 256, 64>}, {pipeline_mode = #tpu.pipeline_mode<synchronous>, transform_indices = @transform_13, window_bounds = array<i64: 1, 64>}, {pipeline_mode = #tpu.pipeline_mode<synchronous>, transform_indices = @transform_14, window_bounds = array<i64: 64, 64>}, {pipeline_mode = #tpu.pipeline_mode<synchronous>, transform_indices = @transform_15, window_bounds = array<i64: 1, 64>}, {pipeline_mode = #tpu.pipeline_mode<synchronous>, transform_indices = @transform_16, window_bounds = array<i64: 64, 128>}, {pipeline_mode = #tpu.pipeline_mode<synchronous>, transform_indices = @transform_17, window_bounds = array<i64: 1, 128>}, {transform_indices = @transform_18, window_bounds = array<i64: 1, 16, 128>}]} {
    %c0 = arith.constant 0 : index
    %c0_0 = arith.constant 0 : index
    %0 = vector.load %arg4[%c0, %c0_0] : memref<24x64xf32, #tpu.memory_space<vmem>>, vector<24x64xf32>
    %c0_1 = arith.constant 0 : index
    %c0_2 = arith.constant 0 : index
    %c0_3 = arith.constant 0 : index
    %1 = vector.load %arg1[%c0_1, %c0_2, %c0_3] : memref<1x24x48xf32, #tpu.memory_space<vmem>>, vector<1x24x48xf32>
    %2 = vector.shape_cast %1 : vector<1x24x48xf32> to vector<24x48xf32>
    %3 = arith.truncf %2 : vector<24x48xf32> to vector<24x48xbf16>
    %c0_4 = arith.constant 0 : index
    %c0_5 = arith.constant 0 : index
    %4 = vector.load %arg6[%c0_4, %c0_5] : memref<48x64xbf16, #tpu.memory_space<vmem>>, vector<48x64xbf16>
    %cst = arith.constant dense<0.000000e+00> : vector<24x64xf32>
    %5 = tpu.matmul %3, %4, %cst {dimension_numbers = #tpu.dot_dimension_numbers<[1], [0], [0], [1], [0, 0, 1, 1], [], []>} : vector<24x48xbf16>, vector<48x64xbf16>, vector<24x64xf32> -> vector<24x64xf32>
    %6 = arith.addf %5, %0 : vector<24x64xf32>
    %c0_6 = arith.constant 0 : index
    %c0_7 = arith.constant 0 : index
    %7 = vector.load %arg5[%c0_6, %c0_7] : memref<8x64xf32, #tpu.memory_space<vmem>>, vector<1x64xf32>
    %c1 = arith.constant 1 : index
    %c0_8 = arith.constant 0 : index
    %8 = vector.load %arg5[%c1, %c0_8] : memref<8x64xf32, #tpu.memory_space<vmem>>, vector<1x64xf32>
    %cst_9 = arith.constant dense<0.000000e+00> : vector<24xf32>
    %9 = vector.multi_reduction <add>, %6, %cst_9 [1] : vector<24x64xf32> to vector<24xf32>
    %10 = vector.shape_cast %9 : vector<24xf32> to vector<24x1xf32>
    %cst_10 = arith.constant 6.400000e+01 : f32
    %11 = vector.broadcast %cst_10 : f32 to vector<24x1xf32>
    %12 = arith.divf %10, %11 : vector<24x1xf32>
    %13 = vector.broadcast %12 : vector<24x1xf32> to vector<24x64xf32>
    %14 = arith.subf %6, %13 : vector<24x64xf32>
    %15 = arith.mulf %14, %14 : vector<24x64xf32>
    %cst_11 = arith.constant dense<0.000000e+00> : vector<24xf32>
    %16 = vector.multi_reduction <add>, %15, %cst_11 [1] : vector<24x64xf32> to vector<24xf32>
    %17 = vector.shape_cast %16 : vector<24xf32> to vector<24x1xf32>
    %cst_12 = arith.constant 6.400000e+01 : f32
    %18 = vector.broadcast %cst_12 : f32 to vector<24x1xf32>
    %19 = arith.divf %17, %18 : vector<24x1xf32>
    %20 = vector.broadcast %12 : vector<24x1xf32> to vector<24x64xf32>
    %21 = arith.subf %6, %20 : vector<24x64xf32>
    %cst_13 = arith.constant 9.99999974E-6 : f32
    %22 = vector.broadcast %cst_13 : f32 to vector<24x1xf32>
    %23 = arith.addf %19, %22 : vector<24x1xf32>
    %24 = math.rsqrt %23 : vector<24x1xf32>
    %25 = vector.broadcast %24 : vector<24x1xf32> to vector<24x64xf32>
    %26 = arith.mulf %21, %25 : vector<24x64xf32>
    %27 = vector.broadcast %7 : vector<1x64xf32> to vector<24x64xf32>
    %28 = arith.mulf %26, %27 : vector<24x64xf32>
    %29 = vector.broadcast %8 : vector<1x64xf32> to vector<24x64xf32>
    %30 = arith.addf %28, %29 : vector<24x64xf32>
    %c2 = arith.constant 2 : index
    %c0_14 = arith.constant 0 : index
    %31 = vector.load %arg5[%c2, %c0_14] : memref<8x64xf32, #tpu.memory_space<vmem>>, vector<1x64xf32>
    %c3 = arith.constant 3 : index
    %c0_15 = arith.constant 0 : index
    %32 = vector.load %arg5[%c3, %c0_15] : memref<8x64xf32, #tpu.memory_space<vmem>>, vector<1x64xf32>
    %cst_16 = arith.constant dense<0.000000e+00> : vector<24xf32>
    %33 = vector.multi_reduction <add>, %30, %cst_16 [1] : vector<24x64xf32> to vector<24xf32>
    %34 = vector.shape_cast %33 : vector<24xf32> to vector<24x1xf32>
    %cst_17 = arith.constant 6.400000e+01 : f32
    %35 = vector.broadcast %cst_17 : f32 to vector<24x1xf32>
    %36 = arith.divf %34, %35 : vector<24x1xf32>
    %37 = vector.broadcast %36 : vector<24x1xf32> to vector<24x64xf32>
    %38 = arith.subf %30, %37 : vector<24x64xf32>
    %39 = arith.mulf %38, %38 : vector<24x64xf32>
    %cst_18 = arith.constant dense<0.000000e+00> : vector<24xf32>
    %40 = vector.multi_reduction <add>, %39, %cst_18 [1] : vector<24x64xf32> to vector<24xf32>
    %41 = vector.shape_cast %40 : vector<24xf32> to vector<24x1xf32>
    %cst_19 = arith.constant 6.400000e+01 : f32
    %42 = vector.broadcast %cst_19 : f32 to vector<24x1xf32>
    %43 = arith.divf %41, %42 : vector<24x1xf32>
    %44 = vector.broadcast %36 : vector<24x1xf32> to vector<24x64xf32>
    %45 = arith.subf %30, %44 : vector<24x64xf32>
    %cst_20 = arith.constant 9.99999974E-6 : f32
    %46 = vector.broadcast %cst_20 : f32 to vector<24x1xf32>
    %47 = arith.addf %43, %46 : vector<24x1xf32>
    %48 = math.rsqrt %47 : vector<24x1xf32>
    %49 = vector.broadcast %48 : vector<24x1xf32> to vector<24x64xf32>
    %50 = arith.mulf %45, %49 : vector<24x64xf32>
    %51 = vector.broadcast %31 : vector<1x64xf32> to vector<24x64xf32>
    %52 = arith.mulf %50, %51 : vector<24x64xf32>
    %53 = vector.broadcast %32 : vector<1x64xf32> to vector<24x64xf32>
    %54 = arith.addf %52, %53 : vector<24x64xf32>
    %c0_21 = arith.constant 0 : index
    %c0_22 = arith.constant 0 : index
    %55 = vector.load %arg8[%c0_21, %c0_22] : memref<1x192xf32, #tpu.memory_space<vmem>>, vector<1x192xf32>
    %56 = arith.truncf %54 : vector<24x64xf32> to vector<24x64xbf16>
    %c0_23 = arith.constant 0 : index
    %c0_24 = arith.constant 0 : index
    %57 = vector.load %arg7[%c0_23, %c0_24] : memref<64x192xbf16, #tpu.memory_space<vmem>>, vector<64x192xbf16>
    %cst_25 = arith.constant dense<0.000000e+00> : vector<24x192xf32>
    %58 = tpu.matmul %56, %57, %cst_25 {dimension_numbers = #tpu.dot_dimension_numbers<[1], [0], [0], [1], [0, 0, 1, 1], [], []>} : vector<24x64xbf16>, vector<64x192xbf16>, vector<24x192xf32> -> vector<24x192xf32>
    %59 = vector.broadcast %55 : vector<1x192xf32> to vector<24x192xf32>
    %60 = arith.addf %58, %59 : vector<24x192xf32>
    %61 = vector.extract_strided_slice %60 {offsets = [0, 0], sizes = [24, 64], strides = [1, 1]} : vector<24x192xf32> to vector<24x64xf32>
    %62 = vector.extract_strided_slice %60 {offsets = [0, 64], sizes = [24, 64], strides = [1, 1]} : vector<24x192xf32> to vector<24x64xf32>
    %63 = vector.extract_strided_slice %60 {offsets = [0, 128], sizes = [24, 64], strides = [1, 1]} : vector<24x192xf32> to vector<24x64xf32>
    %c0_26 = arith.constant 0 : index
    %c0_27 = arith.constant 0 : index
    %c0_28 = arith.constant 0 : index
    %64 = vector.load %arg2[%c0_26, %c0_27, %c0_28] : memref<1x1x24xf32, #tpu.memory_space<vmem>>, vector<1x1x24xf32>
    %65 = vector.shape_cast %64 : vector<1x1x24xf32> to vector<1x24xf32>
    %cst_29 = arith.constant 5.000000e-01 : f32
    %66 = vector.broadcast %cst_29 : f32 to vector<1x24xf32>
    %67 = arith.cmpf ogt, %65, %66 : vector<1x24xf32>
    %68 = arith.truncf %61 : vector<24x64xf32> to vector<24x64xbf16>
    %69 = arith.truncf %62 : vector<24x64xf32> to vector<24x64xbf16>
    %cst_30 = arith.constant dense<0.000000e+00> : vector<24x24xf32>
    %70 = tpu.matmul %68, %69, %cst_30 {dimension_numbers = #tpu.dot_dimension_numbers<[1], [1], [0], [0], [0, 0, 1, 0], [], []>} : vector<24x64xbf16>, vector<24x64xbf16>, vector<24x24xf32> -> vector<24x24xf32>
    %cst_31 = arith.constant -1.000000e+30 : f32
    %71 = vector.shape_cast %67 : vector<1x24xi1> to vector<1x24xi1>
    %72 = vector.broadcast %71 : vector<1x24xi1> to vector<24x24xi1>
    %73 = vector.broadcast %cst_31 : f32 to vector<24x24xf32>
    %74 = arith.select %72, %70, %73 : vector<24x24xi1>, vector<24x24xf32>
    %cst_32 = arith.constant dense<0xFF800000> : vector<24xf32>
    %75 = vector.multi_reduction <maximumf>, %74, %cst_32 [1] : vector<24x24xf32> to vector<24xf32>
    %76 = vector.shape_cast %75 : vector<24xf32> to vector<24x1xf32>
    %77 = vector.broadcast %76 : vector<24x1xf32> to vector<24x24xf32>
    %78 = arith.subf %74, %77 : vector<24x24xf32>
    %79 = math.exp %78 : vector<24x24xf32>
    %cst_33 = arith.constant dense<0.000000e+00> : vector<24xf32>
    %80 = vector.multi_reduction <add>, %79, %cst_33 [1] : vector<24x24xf32> to vector<24xf32>
    %81 = vector.shape_cast %80 : vector<24xf32> to vector<24x1xf32>
    %82 = tpu.reciprocal %81 {approx = true} : vector<24x1xf32> -> vector<24x1xf32>
    %83 = vector.broadcast %82 : vector<24x1xf32> to vector<24x24xf32>
    %84 = arith.mulf %79, %83 : vector<24x24xf32>
    %85 = arith.truncf %84 : vector<24x24xf32> to vector<24x24xbf16>
    %86 = arith.truncf %63 : vector<24x64xf32> to vector<24x64xbf16>
    %cst_34 = arith.constant dense<0.000000e+00> : vector<24x64xf32>
    %87 = tpu.matmul %85, %86, %cst_34 {dimension_numbers = #tpu.dot_dimension_numbers<[1], [0], [0], [1], [0, 0, 1, 1], [], []>} : vector<24x24xbf16>, vector<24x64xbf16>, vector<24x64xf32> -> vector<24x64xf32>
    %c0_35 = arith.constant 0 : index
    %c0_36 = arith.constant 0 : index
    %88 = vector.load %arg10[%c0_35, %c0_36] : memref<1x64xf32, #tpu.memory_space<vmem>>, vector<1x64xf32>
    %89 = arith.truncf %87 : vector<24x64xf32> to vector<24x64xbf16>
    %c0_37 = arith.constant 0 : index
    %c0_38 = arith.constant 0 : index
    %90 = vector.load %arg9[%c0_37, %c0_38] : memref<64x64xbf16, #tpu.memory_space<vmem>>, vector<64x64xbf16>
    %cst_39 = arith.constant dense<0.000000e+00> : vector<24x64xf32>
    %91 = tpu.matmul %89, %90, %cst_39 {dimension_numbers = #tpu.dot_dimension_numbers<[1], [0], [0], [1], [0, 0, 1, 1], [], []>} : vector<24x64xbf16>, vector<64x64xbf16>, vector<24x64xf32> -> vector<24x64xf32>
    %92 = vector.broadcast %88 : vector<1x64xf32> to vector<24x64xf32>
    %93 = arith.addf %91, %92 : vector<24x64xf32>
    %94 = arith.addf %30, %93 : vector<24x64xf32>
    %c4 = arith.constant 4 : index
    %c0_40 = arith.constant 0 : index
    %95 = vector.load %arg5[%c4, %c0_40] : memref<8x64xf32, #tpu.memory_space<vmem>>, vector<1x64xf32>
    %c5 = arith.constant 5 : index
    %c0_41 = arith.constant 0 : index
    %96 = vector.load %arg5[%c5, %c0_41] : memref<8x64xf32, #tpu.memory_space<vmem>>, vector<1x64xf32>
    %cst_42 = arith.constant dense<0.000000e+00> : vector<24xf32>
    %97 = vector.multi_reduction <add>, %94, %cst_42 [1] : vector<24x64xf32> to vector<24xf32>
    %98 = vector.shape_cast %97 : vector<24xf32> to vector<24x1xf32>
    %cst_43 = arith.constant 6.400000e+01 : f32
    %99 = vector.broadcast %cst_43 : f32 to vector<24x1xf32>
    %100 = arith.divf %98, %99 : vector<24x1xf32>
    %101 = vector.broadcast %100 : vector<24x1xf32> to vector<24x64xf32>
    %102 = arith.subf %94, %101 : vector<24x64xf32>
    %103 = arith.mulf %102, %102 : vector<24x64xf32>
    %cst_44 = arith.constant dense<0.000000e+00> : vector<24xf32>
    %104 = vector.multi_reduction <add>, %103, %cst_44 [1] : vector<24x64xf32> to vector<24xf32>
    %105 = vector.shape_cast %104 : vector<24xf32> to vector<24x1xf32>
    %cst_45 = arith.constant 6.400000e+01 : f32
    %106 = vector.broadcast %cst_45 : f32 to vector<24x1xf32>
    %107 = arith.divf %105, %106 : vector<24x1xf32>
    %108 = vector.broadcast %100 : vector<24x1xf32> to vector<24x64xf32>
    %109 = arith.subf %94, %108 : vector<24x64xf32>
    %cst_46 = arith.constant 9.99999974E-6 : f32
    %110 = vector.broadcast %cst_46 : f32 to vector<24x1xf32>
    %111 = arith.addf %107, %110 : vector<24x1xf32>
    %112 = math.rsqrt %111 : vector<24x1xf32>
    %113 = vector.broadcast %112 : vector<24x1xf32> to vector<24x64xf32>
    %114 = arith.mulf %109, %113 : vector<24x64xf32>
    %115 = vector.broadcast %95 : vector<1x64xf32> to vector<24x64xf32>
    %116 = arith.mulf %114, %115 : vector<24x64xf32>
    %117 = vector.broadcast %96 : vector<1x64xf32> to vector<24x64xf32>
    %118 = arith.addf %116, %117 : vector<24x64xf32>
    %c0_47 = arith.constant 0 : index
    %c0_48 = arith.constant 0 : index
    %119 = vector.load %arg12[%c0_47, %c0_48] : memref<1x256xf32, #tpu.memory_space<vmem>>, vector<1x256xf32>
    %120 = arith.truncf %118 : vector<24x64xf32> to vector<24x64xbf16>
    %c0_49 = arith.constant 0 : index
    %c0_50 = arith.constant 0 : index
    %121 = vector.load %arg11[%c0_49, %c0_50] : memref<64x256xbf16, #tpu.memory_space<vmem>>, vector<64x256xbf16>
    %cst_51 = arith.constant dense<0.000000e+00> : vector<24x256xf32>
    %122 = tpu.matmul %120, %121, %cst_51 {dimension_numbers = #tpu.dot_dimension_numbers<[1], [0], [0], [1], [0, 0, 1, 1], [], []>} : vector<24x64xbf16>, vector<64x256xbf16>, vector<24x256xf32> -> vector<24x256xf32>
    %123 = vector.broadcast %119 : vector<1x256xf32> to vector<24x256xf32>
    %124 = arith.addf %122, %123 : vector<24x256xf32>
    %125 = arith.mulf %124, %124 : vector<24x256xf32>
    %126 = arith.mulf %124, %125 : vector<24x256xf32>
    %cst_52 = arith.constant 4.471500e-02 : f32
    %127 = vector.broadcast %cst_52 : f32 to vector<24x256xf32>
    %128 = arith.mulf %127, %126 : vector<24x256xf32>
    %129 = arith.addf %124, %128 : vector<24x256xf32>
    %cst_53 = arith.constant 0.797884583 : f32
    %130 = vector.broadcast %cst_53 : f32 to vector<24x256xf32>
    %131 = arith.mulf %130, %129 : vector<24x256xf32>
    %132 = math.tanh %131 : vector<24x256xf32>
    %cst_54 = arith.constant 1.000000e+00 : f32
    %133 = vector.broadcast %cst_54 : f32 to vector<24x256xf32>
    %134 = arith.addf %133, %132 : vector<24x256xf32>
    %cst_55 = arith.constant 5.000000e-01 : f32
    %135 = vector.broadcast %cst_55 : f32 to vector<24x256xf32>
    %136 = arith.mulf %135, %134 : vector<24x256xf32>
    %137 = arith.mulf %124, %136 : vector<24x256xf32>
    %c0_56 = arith.constant 0 : index
    %c0_57 = arith.constant 0 : index
    %138 = vector.load %arg14[%c0_56, %c0_57] : memref<1x64xf32, #tpu.memory_space<vmem>>, vector<1x64xf32>
    %139 = arith.truncf %137 : vector<24x256xf32> to vector<24x256xbf16>
    %c0_58 = arith.constant 0 : index
    %c0_59 = arith.constant 0 : index
    %140 = vector.load %arg13[%c0_58, %c0_59] : memref<256x64xbf16, #tpu.memory_space<vmem>>, vector<256x64xbf16>
    %cst_60 = arith.constant dense<0.000000e+00> : vector<24x64xf32>
    %141 = tpu.matmul %139, %140, %cst_60 {dimension_numbers = #tpu.dot_dimension_numbers<[1], [0], [0], [1], [0, 0, 1, 1], [], []>} : vector<24x256xbf16>, vector<256x64xbf16>, vector<24x64xf32> -> vector<24x64xf32>
    %142 = vector.broadcast %138 : vector<1x64xf32> to vector<24x64xf32>
    %143 = arith.addf %141, %142 : vector<24x64xf32>
    %144 = arith.addf %94, %143 : vector<24x64xf32>
    %c6 = arith.constant 6 : index
    %c0_61 = arith.constant 0 : index
    %145 = vector.load %arg5[%c6, %c0_61] : memref<8x64xf32, #tpu.memory_space<vmem>>, vector<1x64xf32>
    %c7 = arith.constant 7 : index
    %c0_62 = arith.constant 0 : index
    %146 = vector.load %arg5[%c7, %c0_62] : memref<8x64xf32, #tpu.memory_space<vmem>>, vector<1x64xf32>
    %cst_63 = arith.constant dense<0.000000e+00> : vector<24xf32>
    %147 = vector.multi_reduction <add>, %144, %cst_63 [1] : vector<24x64xf32> to vector<24xf32>
    %148 = vector.shape_cast %147 : vector<24xf32> to vector<24x1xf32>
    %cst_64 = arith.constant 6.400000e+01 : f32
    %149 = vector.broadcast %cst_64 : f32 to vector<24x1xf32>
    %150 = arith.divf %148, %149 : vector<24x1xf32>
    %151 = vector.broadcast %150 : vector<24x1xf32> to vector<24x64xf32>
    %152 = arith.subf %144, %151 : vector<24x64xf32>
    %153 = arith.mulf %152, %152 : vector<24x64xf32>
    %cst_65 = arith.constant dense<0.000000e+00> : vector<24xf32>
    %154 = vector.multi_reduction <add>, %153, %cst_65 [1] : vector<24x64xf32> to vector<24xf32>
    %155 = vector.shape_cast %154 : vector<24xf32> to vector<24x1xf32>
    %cst_66 = arith.constant 6.400000e+01 : f32
    %156 = vector.broadcast %cst_66 : f32 to vector<24x1xf32>
    %157 = arith.divf %155, %156 : vector<24x1xf32>
    %158 = vector.broadcast %150 : vector<24x1xf32> to vector<24x64xf32>
    %159 = arith.subf %144, %158 : vector<24x64xf32>
    %cst_67 = arith.constant 9.99999974E-6 : f32
    %160 = vector.broadcast %cst_67 : f32 to vector<24x1xf32>
    %161 = arith.addf %157, %160 : vector<24x1xf32>
    %162 = math.rsqrt %161 : vector<24x1xf32>
    %163 = vector.broadcast %162 : vector<24x1xf32> to vector<24x64xf32>
    %164 = arith.mulf %159, %163 : vector<24x64xf32>
    %165 = vector.broadcast %145 : vector<1x64xf32> to vector<24x64xf32>
    %166 = arith.mulf %164, %165 : vector<24x64xf32>
    %167 = vector.broadcast %146 : vector<1x64xf32> to vector<24x64xf32>
    %168 = arith.addf %166, %167 : vector<24x64xf32>
    %169 = arith.truncf %168 : vector<24x64xf32> to vector<24x64xbf16>
    %c0_68 = arith.constant 0 : index
    %c0_69 = arith.constant 0 : index
    %170 = vector.load %arg15[%c0_68, %c0_69] : memref<64x64xbf16, #tpu.memory_space<vmem>>, vector<64x64xbf16>
    %cst_70 = arith.constant dense<0.000000e+00> : vector<24x64xf32>
    %171 = tpu.matmul %169, %170, %cst_70 {dimension_numbers = #tpu.dot_dimension_numbers<[1], [0], [0], [1], [0, 0, 1, 1], [], []>} : vector<24x64xbf16>, vector<64x64xbf16>, vector<24x64xf32> -> vector<24x64xf32>
    %c0_71 = arith.constant 0 : index
    %c0_72 = arith.constant 0 : index
    %172 = vector.load %arg16[%c0_71, %c0_72] : memref<1x64xf32, #tpu.memory_space<vmem>>, vector<1x64xf32>
    %c0_73 = arith.constant 0 : index
    %c0_74 = arith.constant 0 : index
    %173 = vector.load %arg18[%c0_73, %c0_74] : memref<1x128xf32, #tpu.memory_space<vmem>>, vector<1x128xf32>
    %174 = vector.extract_strided_slice %171 {offsets = [0, 0], sizes = [16, 64], strides = [1, 1]} : vector<24x64xf32> to vector<16x64xf32>
    %c0_75 = arith.constant 0 : index
    %c0_76 = arith.constant 0 : index
    %c0_77 = arith.constant 0 : index
    %175 = vector.load %arg3[%c0_75, %c0_76, %c0_77] : memref<1x16x1xf32, #tpu.memory_space<vmem>>, vector<1x16x1xf32>
    %176 = vector.shape_cast %175 : vector<1x16x1xf32> to vector<16x1xf32>
    %177 = vector.broadcast %172 : vector<1x64xf32> to vector<16x64xf32>
    %178 = arith.subf %174, %177 : vector<16x64xf32>
    %179 = vector.broadcast %176 : vector<16x1xf32> to vector<16x64xf32>
    %180 = arith.mulf %179, %178 : vector<16x64xf32>
    %181 = vector.broadcast %172 : vector<1x64xf32> to vector<16x64xf32>
    %182 = arith.addf %181, %180 : vector<16x64xf32>
    %183 = vector.extract_strided_slice %182 {offsets = [0, 0], sizes = [16, 16], strides = [1, 1]} : vector<16x64xf32> to vector<16x16xf32>
    %184 = arith.truncf %183 : vector<16x16xf32> to vector<16x16xbf16>
    %c0_78 = arith.constant 0 : index
    %c0_79 = arith.constant 0 : index
    %185 = vector.load %arg17[%c0_78, %c0_79] : memref<64x128xbf16, #tpu.memory_space<vmem>>, vector<16x128xbf16>
    %cst_80 = arith.constant dense<0.000000e+00> : vector<16x128xf32>
    %186 = tpu.matmul %184, %185, %cst_80 {dimension_numbers = #tpu.dot_dimension_numbers<[0], [0], [1], [1], [0, 1, 1, 1], [], []>} : vector<16x16xbf16>, vector<16x128xbf16>, vector<16x128xf32> -> vector<16x128xf32>
    %187 = vector.broadcast %173 : vector<1x128xf32> to vector<16x128xf32>
    %188 = arith.addf %187, %186 : vector<16x128xf32>
    %189 = vector.extract_strided_slice %182 {offsets = [0, 16], sizes = [16, 16], strides = [1, 1]} : vector<16x64xf32> to vector<16x16xf32>
    %190 = arith.truncf %189 : vector<16x16xf32> to vector<16x16xbf16>
    %c16 = arith.constant 16 : index
    %c0_81 = arith.constant 0 : index
    %191 = vector.load %arg17[%c16, %c0_81] : memref<64x128xbf16, #tpu.memory_space<vmem>>, vector<16x128xbf16>
    %cst_82 = arith.constant dense<0.000000e+00> : vector<16x128xf32>
    %192 = tpu.matmul %190, %191, %cst_82 {dimension_numbers = #tpu.dot_dimension_numbers<[0], [0], [1], [1], [0, 1, 1, 1], [], []>} : vector<16x16xbf16>, vector<16x128xbf16>, vector<16x128xf32> -> vector<16x128xf32>
    %193 = arith.addf %188, %192 : vector<16x128xf32>
    %194 = vector.extract_strided_slice %182 {offsets = [0, 32], sizes = [16, 16], strides = [1, 1]} : vector<16x64xf32> to vector<16x16xf32>
    %195 = arith.truncf %194 : vector<16x16xf32> to vector<16x16xbf16>
    %c32 = arith.constant 32 : index
    %c0_83 = arith.constant 0 : index
    %196 = vector.load %arg17[%c32, %c0_83] : memref<64x128xbf16, #tpu.memory_space<vmem>>, vector<16x128xbf16>
    %cst_84 = arith.constant dense<0.000000e+00> : vector<16x128xf32>
    %197 = tpu.matmul %195, %196, %cst_84 {dimension_numbers = #tpu.dot_dimension_numbers<[0], [0], [1], [1], [0, 1, 1, 1], [], []>} : vector<16x16xbf16>, vector<16x128xbf16>, vector<16x128xf32> -> vector<16x128xf32>
    %198 = arith.addf %193, %197 : vector<16x128xf32>
    %199 = vector.extract_strided_slice %182 {offsets = [0, 48], sizes = [16, 16], strides = [1, 1]} : vector<16x64xf32> to vector<16x16xf32>
    %200 = arith.truncf %199 : vector<16x16xf32> to vector<16x16xbf16>
    %c48 = arith.constant 48 : index
    %c0_85 = arith.constant 0 : index
    %201 = vector.load %arg17[%c48, %c0_85] : memref<64x128xbf16, #tpu.memory_space<vmem>>, vector<16x128xbf16>
    %cst_86 = arith.constant dense<0.000000e+00> : vector<16x128xf32>
    %202 = tpu.matmul %200, %201, %cst_86 {dimension_numbers = #tpu.dot_dimension_numbers<[0], [0], [1], [1], [0, 1, 1, 1], [], []>} : vector<16x16xbf16>, vector<16x128xbf16>, vector<16x128xf32> -> vector<16x128xf32>
    %203 = arith.addf %198, %202 : vector<16x128xf32>
    %c0_87 = arith.constant 0 : index
    %c0_88 = arith.constant 0 : index
    %c0_89 = arith.constant 0 : index
    %204 = vector.load %arg19[%c0_87, %c0_88, %c0_89] : memref<1x16x128xf32, #tpu.memory_space<vmem>>, vector<1x16x128xf32>
    %205 = vector.shape_cast %204 : vector<1x16x128xf32> to vector<16x128xf32>
    %206 = vector.shape_cast %203 : vector<16x128xf32> to vector<1x16x128xf32>
    tpu.vector_store %arg19[%c0_87, %c0_88, %c0_89], %206 {strides = array<i32>} : memref<1x16x128xf32, #tpu.memory_space<vmem>>, vector<1x16x128xf32>,
    return
  }
  func.func @transform_0(%arg0: i32) -> (i32, i32, i32) {
    %c0_i32 = arith.constant 0 : i32
    %c0_i32_0 = arith.constant 0 : i32
    %c0_i32_1 = arith.constant 0 : i32
    return %arg0, %c0_i32, %c0_i32_0 : i32, i32, i32
  }
  func.func @transform_1(%arg0: i32) -> (i32, i32, i32) {
    %c0_i32 = arith.constant 0 : i32
    %c0_i32_0 = arith.constant 0 : i32
    %c0_i32_1 = arith.constant 0 : i32
    return %arg0, %c0_i32, %c0_i32_0 : i32, i32, i32
  }
  func.func @transform_2(%arg0: i32) -> (i32, i32, i32) {
    %c0_i32 = arith.constant 0 : i32
    %c0_i32_0 = arith.constant 0 : i32
    %c0_i32_1 = arith.constant 0 : i32
    return %arg0, %c0_i32, %c0_i32_0 : i32, i32, i32
  }
  func.func @transform_3(%arg0: i32) -> (i32, i32) {
    %c0_i32 = arith.constant 0 : i32
    %c0_i32_0 = arith.constant 0 : i32
    %c0_i32_1 = arith.constant 0 : i32
    return %c0_i32, %c0_i32_0 : i32, i32
  }
  func.func @transform_4(%arg0: i32) -> (i32, i32) {
    %c0_i32 = arith.constant 0 : i32
    %c0_i32_0 = arith.constant 0 : i32
    %c0_i32_1 = arith.constant 0 : i32
    return %c0_i32, %c0_i32_0 : i32, i32
  }
  func.func @transform_5(%arg0: i32) -> (i32, i32) {
    %c0_i32 = arith.constant 0 : i32
    %c0_i32_0 = arith.constant 0 : i32
    %c0_i32_1 = arith.constant 0 : i32
    return %c0_i32, %c0_i32_0 : i32, i32
  }
  func.func @transform_6(%arg0: i32) -> (i32, i32) {
    %c0_i32 = arith.constant 0 : i32
    %c0_i32_0 = arith.constant 0 : i32
    %c0_i32_1 = arith.constant 0 : i32
    return %c0_i32, %c0_i32_0 : i32, i32
  }
  func.func @transform_7(%arg0: i32) -> (i32, i32) {
    %c0_i32 = arith.constant 0 : i32
    %c0_i32_0 = arith.constant 0 : i32
    %c0_i32_1 = arith.constant 0 : i32
    return %c0_i32, %c0_i32_0 : i32, i32
  }
  func.func @transform_8(%arg0: i32) -> (i32, i32) {
    %c0_i32 = arith.constant 0 : i32
    %c0_i32_0 = arith.constant 0 : i32
    %c0_i32_1 = arith.constant 0 : i32
    return %c0_i32, %c0_i32_0 : i32, i32
  }
  func.func @transform_9(%arg0: i32) -> (i32, i32) {
    %c0_i32 = arith.constant 0 : i32
    %c0_i32_0 = arith.constant 0 : i32
    %c0_i32_1 = arith.constant 0 : i32
    return %c0_i32, %c0_i32_0 : i32, i32
  }
  func.func @transform_10(%arg0: i32) -> (i32, i32) {
    %c0_i32 = arith.constant 0 : i32
    %c0_i32_0 = arith.constant 0 : i32
    %c0_i32_1 = arith.constant 0 : i32
    return %c0_i32, %c0_i32_0 : i32, i32
  }
  func.func @transform_11(%arg0: i32) -> (i32, i32) {
    %c0_i32 = arith.constant 0 : i32
    %c0_i32_0 = arith.constant 0 : i32
    %c0_i32_1 = arith.constant 0 : i32
    return %c0_i32, %c0_i32_0 : i32, i32
  }
  func.func @transform_12(%arg0: i32) -> (i32, i32) {
    %c0_i32 = arith.constant 0 : i32
    %c0_i32_0 = arith.constant 0 : i32
    %c0_i32_1 = arith.constant 0 : i32
    return %c0_i32, %c0_i32_0 : i32, i32
  }
  func.func @transform_13(%arg0: i32) -> (i32, i32) {
    %c0_i32 = arith.constant 0 : i32
    %c0_i32_0 = arith.constant 0 : i32
    %c0_i32_1 = arith.constant 0 : i32
    return %c0_i32, %c0_i32_0 : i32, i32
  }
  func.func @transform_14(%arg0: i32) -> (i32, i32) {
    %c0_i32 = arith.constant 0 : i32
    %c0_i32_0 = arith.constant 0 : i32
    %c0_i32_1 = arith.constant 0 : i32
    return %c0_i32, %c0_i32_0 : i32, i32
  }
  func.func @transform_15(%arg0: i32) -> (i32, i32) {
    %c0_i32 = arith.constant 0 : i32
    %c0_i32_0 = arith.constant 0 : i32
    %c0_i32_1 = arith.constant 0 : i32
    return %c0_i32, %c0_i32_0 : i32, i32
  }
  func.func @transform_16(%arg0: i32) -> (i32, i32) {
    %c0_i32 = arith.constant 0 : i32
    %c0_i32_0 = arith.constant 0 : i32
    %c0_i32_1 = arith.constant 0 : i32
    return %c0_i32, %c0_i32_0 : i32, i32
  }
  func.func @transform_17(%arg0: i32) -> (i32, i32) {
    %c0_i32 = arith.constant 0 : i32
    %c0_i32_0 = arith.constant 0 : i32
    %c0_i32_1 = arith.constant 0 : i32
    return %c0_i32, %c0_i32_0 : i32, i32
  }
  func.func @transform_18(%arg0: i32) -> (i32, i32, i32) {
    %c0_i32 = arith.constant 0 : i32
    %c0_i32_0 = arith.constant 0 : i32
    %c0_i32_1 = arith.constant 0 : i32
    return %arg0, %c0_i32, %c0_i32_0 : i32, i32, i32
  }
}

</mosaic_0001>

<bundles_post_ra>
// kernel: _lambda_.1
= control target key start
LH: loop header
LB: loop body
LE: loop exit
PB: predicated region body
PF: predicated region fallthrough
CT: control target
= control target key end

     0   :  { %s3146_s0 = inlined_call_operand.vmem [shape: f32[2,24,48], index: 0, kind: input, shape index: {}]   ;;  %s3147_s1 = inlined_call_operand.vmem [shape: f32[2,1,24], index: 1, kind: input, shape index: {}]   ;;  %s3148_s2 = inlined_call_operand.vmem [shape: f32[2,16,1], index: 2, kind: input, shape index: {}]   ;;  %s3149_s3 = inlined_call_operand.vmem [shape: f32[24,64], index: 3, kind: input, shape index: {}]   ;;  %s3150_s4 = inlined_call_operand.vmem [shape: f32[8,64], index: 4, kind: input, shape index: {}]   ;;  %s3151_s5 = inlined_call_operand.vmem [shape: bf16[48,64], index: 5, kind: input, shape index: {}]   ;;  %s3152_s6 = inlined_call_operand.vmem [shape: bf16[64,192], index: 6, kind: input, shape index: {}]   ;;  %s3153_s7 = inlined_call_operand.vmem [shape: f32[1,192], index: 7, kind: input, shape index: {}]   ;;  %s3154_s8 = inlined_call_operand.vmem [shape: bf16[64,64], index: 8, kind: input, shape index: {}]   ;;  %s3155_s9 = inlined_call_operand.vmem [shape: f32[1,64], index: 9, kind: input, shape index: {}, may-alias: {9,13,15}]   ;;  %s3156_s10 = inlined_call_operand.vmem [shape: bf16[64,256], index: 10, kind: input, shape index: {}]   ;;  %s3157_s11 = inlined_call_operand.vmem [shape: f32[1,256], index: 11, kind: input, shape index: {}]   ;;  %s3158_s12 = inlined_call_operand.vmem [shape: bf16[256,64], index: 12, kind: input, shape index: {}]   ;;  %s3159_s13 = inlined_call_operand.vmem [shape: f32[1,64], index: 13, kind: input, shape index: {}, may-alias: {9,13,15}]   ;;  %s3160_s14 = inlined_call_operand.vmem [shape: bf16[64,64], index: 14, kind: input, shape index: {}]   ;;  %s3161_s15 = inlined_call_operand.vmem [shape: f32[1,64], index: 15, kind: input, shape index: {}, may-alias: {9,13,15}]   ;;  %s3162_s16 = inlined_call_operand.vmem [shape: bf16[64,128], index: 16, kind: input, shape index: {}]   ;;  %s3163_s17 = inlined_call_operand.vmem [shape: f32[1,128], index: 17, kind: input, shape index: {}]   ;;  %s3164_s18 = inlined_call_operand.hbm [shape: f32[2,16,128], index: 18, kind: output, shape index: {}]  }
   0x1   :  { %3169 = sst [smem:[#allocation9_spill]] %s3146_s0 }
   0x2   :  { %3170 = sst [smem:[#allocation10_spill]] %s3147_s1 }
   0x3   :  { %3171 = sst [smem:[#allocation11_spill]] %s3148_s2 }
   0x4   :  { %3172 = sst [smem:[#allocation12_spill]] %s3149_s3 }
   0x5   :  { %23 = vsyncpa [#allocation3], 0 }
   0x6   :  { %25 = vsyncpa [#allocation3 + $0x1], 0  ;;  %s2734_s27 = smov 0   ;;  %s2736_s28 = smov 0  }
   0x7   :  { %s2738_s29 = smov 0   ;;  %s2740_s30 = smov 0  }
   0x8 LB: > { %3173 = sst [smem:[#allocation5_spill]] %s2623_s29  ;;  %s2755_s0 = sadd.s32 4294967295, %s2627_s30   ;;  %s2627_s30 = sphi %s2740_s30, %s3184_s30   ;;  %s2623_s29 = sphi %s2738_s29, %s3186_s29   ;;  %s2619_s28 = sphi %s2736_s28, %s3188_s28   ;;  %s2615_s27 = sphi %s2734_s27, %s3187_s27  }
   0x9   : > { %s2183_s19 = sadd.s32 4294967294, %s2627_s30   ;;  %s2759_s1 = sadd.s32 1, %s2627_s30  }
   0xa   : > { %3174 = sst [smem:[#allocation6_spill]] %s2759_s1  ;;  %s431_s20 = sadd.s32 1, %s2623_s29 }
   0xb   : > { %s428_s21 = ssub.s32 %s2627_s30, %s2759_s1  ;;  %p441_p0 = scmp.ne.s32.totalorder %s2623_s29, %s2619_s28 }
   0xc   : > { %p429_p1 = scmp.eq.s32.totalorder %s428_s21, 0  ;;  %p442_p2 = scmp.eq.s32.totalorder %s2755_s0, 1 }
   0xd   : > { %p447_p3 = scmp.ne.s32.totalorder %s2619_s28, %s2615_s27  ;;  %p448_p4 = scmp.eq.s32.totalorder %s2183_s19, 1 }
   0xe   : > { %s2770_s22 = scalar_select %p429_p1, %s2623_s29, %s431_s20  }
   0xf   : > { %p2772_p5 = por %p442_p2, %p441_p0  ;;  %p2776_p6 = por %p448_p4, %p447_p3 }
  0x10   : > { %3175 = sst [smem:[#allocation7_spill]] %s2770_s22  ;;  %p2186_p7 = scmp.ge.s32.totalorder %s2627_s30, 1 }
  0x11   : > { %s3177_s23 = scalar_select %p2776_p6, 1, 0 }
  0x12   : > { %p533_p8 = scmp.lt.s32.totalorder %s2627_s30, 3 }
  0x13   : > { %3178 = sst [smem:[#allocation8_spill]] %s3177_s23 }
  0x14   : > { %p534_p9 = pnand %p2186_p7, %p533_p8 }
  0x15   : > { %p595_p10 = scmp.lt.s32.totalorder (!%p534_p9), %s2755_s0, 1  ;;  %s3179_s1 = sld [smem:[#allocation9_spill]] (!%p534_p9) }
  0x16   : > { %537 = sbr.rel (%p534_p9) target bundleno = 3827 (0xef3), region = 92  ;;  %s3180_s3 = sld [smem:[#allocation12_spill]] (!%p534_p9) }
  0x17   : > { %s3181_s25 = sld [smem:[#allocation10_spill]] (!%p534_p9)  ;;  %s2274_s22 = sshll.u32 (!%p534_p9), %s2755_s0, 8 }
  0x1b   : > { %v2464_v0 = vld [vmem:[%s3151_s5 + $0x10] sm:$0xff]   ;;  %v2465_v1 = vld [vmem:[%s3151_s5 + $0x8] sm:$0xff]   ;;  %s2790_s20 = scalar_select %p595_p10, %s2755_s0, 1  ;;  %v2466_v2 = vld [vmem:[%s3151_s5] sm:$0xff]   ;;  %vm641_vm0 = vcmask 392192   ;;  %vm698_vm1 = vcmask 523264  }
  0x1c   : > { %2336 = vmatprep.subr.bf16.mxu0 %v2464_v0  ;;  %v611_v8 = vld [vmem:[%s3180_s3 + $0x10] sm:$0xff]  ;;  %v609_v10 = vld [vmem:[%s3180_s3] sm:$0xff]  ;;  %v610_v16 = vld [vmem:[%s3180_s3 + $0x8] sm:$0xff]  ;;  %vm1050_vm2 = vcmask 1043456   ;;  %vm1006_vm5 = vcmask 195584   ;;  %vm2632_vm6 = vmmov 0  }
  0x1d   : > { %2337 = vmatpush3.bf16.msra.mxu0 %v2464_v0  ;;  %s2413_s29 = smul.u32 24, %s2790_s20  ;;  %v2196_v46 = vld [vmem:[%s3150_s4] ss:$0 sm:$0xff]  ;;  %v2197_v48 = vld [vmem:[%s3150_s4 + $0x1] ss:$0 sm:$0xff]  ;;  %s602_s26 = scalar_lea.vmem %s3181_s25, %s2790_s20  ;;  %vm1811_vm7 = vcmask 130048  }
  0x1e   : > { %2338 = vmatprep.subr.bf16.mxu0 %v2465_v1  ;;  %s3182_s25 = sld [smem:[#allocation11_spill]]  ;;  %s2633_s3 = smov 112  }
  0x1f   : > { %s599_s23 = scalar_lea.vmem %s3179_s1, %s2413_s29  ;;  %s2630_s1 = smov 64  }
  0x20   : > { %v612_v3 = vld [vmem:[%s599_s23] sm:$0xff]  ;;  %v613_v4 = vld [vmem:[%s599_s23 + $0x8] sm:$0xff]  ;;  %v614_v5 = vld [vmem:[%s599_s23 + $0x10] sm:$0xff]  ;;  %s2273_s23 = sshll.u32 %s2790_s20, 4  ;;  %s3104_s29 = scalar_lea.hbm %s3164_s18, %s2274_s22 }
  0x21   : > { %2339 = vmatpush3.bf16.msra.mxu0 %v2465_v1  ;;  %v615_v6 = vpack.c.bf16 %v613_v4, %v612_v3  ;;  %v616_v7 = vpack.c.bf16 %v614_v5, %v614_v5  ;;  %s2636_s0 = smov [#allocation2]  }
  0x22   : > { %2340 = vmatprep.subr.bf16.mxu0 %v2466_v2  ;;  %s2571_s24 = sshll.u32 %s2636_s0, 4  ;;  %s2572_s24 = int_to_ptr.vmem [resolvable:$false] %s2571_s24 }
  0x23   : > { %2342 = vmatprep.mubr.msk.bf16.mxu0 %vm641_vm0, %v615_v6 }
  0x25   : > { %2341 = vmatpush3.bf16.msra.mxu0 %v2466_v2 }
  0x28   : > { %2343 = vmatmul.mubr.msk.bf16.vlgmr.msra.gmra.mxu0 %vm641_vm0, %v616_v7 }
  0xe8   : > { %v2344_v9 = vpop.f32.mrf.mxu0 }
  0xe9   : > { %v691_v11 = vadd.f32 %v2344_v9, %v611_v8 }
  0xea   : > { %v682_v12 = vpop.f32.mrf.mxu0 }
  0xeb   : > { %v683_v13 = vadd.f32 %v682_v12, %v609_v10  ;;  %v705_v14 = vsel %vm698_vm1, %v691_v11, 0.0 }
  0xec   : > { %706 = vadd.xlane.f32.xlu1 %v705_v14  ;;  %v2345_v15 = vpop.f32.mrf.mxu0  ;;  %v2469_v14 = vld [vmem:[%s3152_s6 + $0x30] ss:$8 sps:$4 sm:$0xff]  }
  0xed   : > { %v699_v17 = vsel %vm698_vm1, %v683_v13, 0.0  ;;  %v2470_v15 = vld [vmem:[%s3152_s6 + $0x24] ss:$8 sps:$4 sm:$0xff]  }
  0xee   : > { %v685_v18 = vpop.f32.mrf.mxu0  ;;  %700 = vadd.xlane.f32.xlu0 %v699_v17  ;;  %v2629_v17 = vmov 0  }
  0xef   : > { %v686_v19 = vadd.f32 %v685_v18, %v610_v16  ;;  %v2472_v16 = vld [vmem:[%s3152_s6 + $0x20] ss:$8 sps:$4 sm:$0xff]   ;;  %908 = vmatprep.mubr.bf16.mxu1 %v2629_v17  ;;  %v2473_v18 = vld [vmem:[%s3152_s6 + $0x14] ss:$8 sps:$4 sm:$0xff]   ;;  %2462 = vset.pattern.permute.xlu0 %v2629_v17 }
  0xf0   : > { %2463 = vset.pattern.permute.xlu1 %v2629_v17 }
  0xf1   : > { %v702_v20 = vsel %vm698_vm1, %v686_v19, 0.0 }
  0xf2   : > { %703 = vadd.xlane.f32.xlu0 %v702_v20  ;;  %v2476_v20 = vld [vmem:[%s3152_s6 + $0x4] ss:$8 sps:$4 sm:$0xff]  }
 0x175   : > { %v707_v21 = vpop.xlane.xlu1 %706 }
 0x176   : > { %v711_v22 = vmul.f32 0.015625, %v707_v21  ;;  %v2478_v21 = vld [vmem:[%s3152_s6] ss:$8 sps:$4 sm:$0xff]  }
 0x177   : > { %v701_v23 = vpop.xlane.xlu0 %700 }
 0x178   : > { %v709_v24 = vmul.f32 0.015625, %v701_v23  ;;  %v714_v25 = vsub.f32 %v691_v11, %v711_v22 }
 0x17a   : > { %v712_v26 = vsub.f32 %v683_v13, %v709_v24  ;;  %v717_v32 = vmul.f32 %v714_v25, %v714_v25  ;;  %v2467_v13 = vld [vmem:[%s3152_s6 + $0x34] ss:$8 sps:$4 sm:$0xff]  }
 0x17b   : > { %v704_v27 = vpop.xlane.xlu0 %703  ;;  %884 = vmatprep.subr.bf16.mxu1 %v2467_v13 }
 0x17c   : > { %v710_v28 = vmul.f32 0.015625, %v704_v27  ;;  %v715_v29 = vmul.f32 %v712_v26, %v712_v26  ;;  %v724_v34 = vsel %vm698_vm1, %v717_v32, 0.0  ;;  %885 = vmatpush1.bf16.msra.mxu1 %v2469_v14 }
 0x17d   : > { %886 = vmatprep.subr.bf16.mxu1 %v2470_v15 }
 0x17e   : > { %v713_v30 = vsub.f32 %v686_v19, %v710_v28  ;;  %v718_v31 = vsel %vm698_vm1, %v715_v29, 0.0  ;;  %v2475_v19 = vld [vmem:[%s3152_s6 + $0x10] ss:$8 sps:$4 sm:$0xff]  }
 0x17f   : > { %719 = vadd.xlane.f32.xlu1 %v718_v31 }
 0x180   : > { %v716_v33 = vmul.f32 %v713_v30, %v713_v30  ;;  %887 = vmatpush1.bf16.msra.mxu1 %v2472_v16  ;;  %v927_v16 = vld [vmem:[%s602_s26] sm:$0x1]  ;;  %s607_s26 = scalar_lea.vmem %s3182_s25, %s2273_s23  ;;  %s2634_s25 = smov 96  }
 0x181   : > { %888 = vmatprep.subr.bf16.mxu1 %v2473_v18  ;;  %vm928_vm3 = vcmp.gt.f32.partialorder %v927_v16, 0.5 }
 0x182   : > { %v721_v35 = vsel %vm698_vm1, %v716_v33, 0.0  ;;  %v2198_v33 = vld [vmem:[%s3150_s4 + $0x2] ss:$0 sm:$0xff]  ;;  %v997_v18 = vsel %vm928_vm3, 1, %v2629_v17 }
 0x183   : > { %725 = vadd.xlane.f32.xlu1 %v724_v34  ;;  %722 = vadd.xlane.f32.xlu0 %v721_v35 }
 0x184   : > { %889 = vmatpush1.bf16.msra.mxu1 %v2475_v19 }
 0x185   : > { %890 = vmatprep.subr.bf16.mxu1 %v2476_v20 }
 0x188   : > { %891 = vmatpush1.bf16.msra.mxu1 %v2478_v21 }
 0x208   : > { %v720_v36 = vpop.xlane.xlu1 %719 }
 0x209   : > { %v727_v37 = vmul.f32 0.015625, %v720_v36 }
 0x20b   : > { %v730_v38 = vadd.f32 1e-05, %v727_v37 }
 0x20c   : > { %v726_v39 = vpop.xlane.xlu1 %725  ;;  %v723_v40 = vpop.xlane.xlu0 %722 }
 0x20d   : > { %2519 = vrsqrt.f32 %v730_v38  ;;  %v729_v41 = vmul.f32 0.015625, %v726_v39  ;;  %v728_v42 = vmul.f32 0.015625, %v723_v40  ;;  %v2199_v38 = vld [vmem:[%s3150_s4 + $0x3] ss:$0 sm:$0xff] }
 0x20f   : > { %v732_v43 = vadd.f32 1e-05, %v729_v41  ;;  %v731_v44 = vadd.f32 1e-05, %v728_v42 }
 0x211   : > { %2521 = vrsqrt.f32 %v732_v43 }
 0x212   : > { %2523 = vrsqrt.f32 %v731_v44 }
 0x21a   : > { %v2520_v45 = vpop.eup %2519 }
 0x21b   : > { %v736_v47 = vmul.f32 %v2520_v45, %v712_v26 }
 0x21d   : > { %v743_v49 = vmul.f32 %v2196_v46, %v736_v47  ;;  %v820_v47 = vlaneseq }
 0x21e   : > { %v2522_v50 = vpop.eup %2521 }
 0x21f   : > { %v2524_v51 = vpop.eup %2523  ;;  %v2820_v52 = vadd.f32 %v2197_v48, %v743_v49  ;;  %v738_v53 = vmul.f32 %v2522_v50, %v714_v25  ;;  %v808_v50 = vld [vmem:[%s3153_s7] sm:$0x3] }
 0x220   : > { %v737_v54 = vmul.f32 %v2524_v51, %v713_v30 }
 0x221   : > { %v755_v55 = vsel %vm698_vm1, %v2820_v52, 0.0  ;;  %v745_v56 = vmul.f32 %v2196_v46, %v738_v53 }
 0x222   : > { %756 = vadd.xlane.f32.xlu0 %v755_v55  ;;  %v744_v57 = vmul.f32 %v2196_v46, %v737_v54 }
 0x223   : > { %v2824_v58 = vadd.f32 %v2197_v48, %v745_v56 }
 0x224   : > { %v2826_v59 = vadd.f32 %v2197_v48, %v744_v57  ;;  %v2874_v48 = vshrl.u32 %v820_v47, 7 }
 0x225   : > { %v761_v60 = vsel %vm698_vm1, %v2824_v58, 0.0 }
 0x226   : > { %762 = vadd.xlane.f32.xlu0 %v761_v60  ;;  %v758_v61 = vsel %vm698_vm1, %v2826_v59, 0.0  ;;  %v2877_v49 = vsub.s32 0, %v2874_v48  ;;  %v826_v57 = vsub.s32 1, %v2874_v48 }
 0x227   : > { %759 = vadd.xlane.f32.xlu1 %v758_v61 }
 0x228   : > { %v823_v53 = vrot.slane %v808_v50, %v2877_v49  ;;  %v1001_v19 = vrot.slane %v997_v18, %v2877_v49 }
 0x22a   : > { %vm1002_vm4 = vcmp.eq.s32.totalorder %v1001_v19, 1 }
 0x2ab   : > { %v757_v62 = vpop.xlane.xlu0 %756 }
 0x2ac   : > { %v764_v63 = vmul.f32 0.015625, %v757_v62 }
 0x2ae   : > { %v767_v0 = vsub.f32 %v2820_v52, %v764_v63 }
 0x2af   : > { %v763_v1 = vpop.xlane.xlu0 %762 }
 0x2b0   : > { %v760_v2 = vpop.xlane.xlu1 %759  ;;  %v766_v3 = vmul.f32 0.015625, %v763_v1  ;;  %v770_v4 = vmul.f32 %v767_v0, %v767_v0 }
 0x2b1   : > { %v765_v5 = vmul.f32 0.015625, %v760_v2 }
 0x2b2   : > { %v769_v6 = vsub.f32 %v2824_v58, %v766_v3  ;;  %v773_v7 = vsel %vm698_vm1, %v770_v4, 0.0 }
 0x2b3   : > { %v768_v8 = vsub.f32 %v2826_v59, %v765_v5  ;;  %774 = vadd.xlane.f32.xlu1 %v773_v7 }
 0x2b4   : > { %v772_v9 = vmul.f32 %v769_v6, %v769_v6 }
 0x2b5   : > { %v771_v10 = vmul.f32 %v768_v8, %v768_v8 }
 0x2b6   : > { %v779_v11 = vsel %vm698_vm1, %v772_v9, 0.0 }
 0x2b7   : > { %v776_v12 = vsel %vm698_vm1, %v771_v10, 0.0  ;;  %780 = vadd.xlane.f32.xlu1 %v779_v11 }
 0x2b8   : > { %777 = vadd.xlane.f32.xlu0 %v776_v12 }
 0x33c   : > { %v775_v22 = vpop.xlane.xlu1 %774 }
 0x33d   : > { %v782_v23 = vmul.f32 0.015625, %v775_v22 }
 0x33f   : > { %v785_v24 = vadd.f32 1e-05, %v782_v23 }
 0x340   : > { %v781_v25 = vpop.xlane.xlu1 %780 }
 0x341   : > { %2525 = vrsqrt.f32 %v785_v24  ;;  %v784_v26 = vmul.f32 0.015625, %v781_v25  ;;  %v778_v27 = vpop.xlane.xlu0 %777 }
 0x342   : > { %v783_v28 = vmul.f32 0.015625, %v778_v27 }
 0x343   : > { %v787_v29 = vadd.f32 1e-05, %v784_v26 }
 0x344   : > { %v786_v30 = vadd.f32 1e-05, %v783_v28 }
 0x345   : > { %2527 = vrsqrt.f32 %v787_v29 }
 0x346   : > { %2529 = vrsqrt.f32 %v786_v30 }
 0x34e   : > { %v2526_v31 = vpop.eup %2525 }
 0x34f   : > { %v791_v32 = vmul.f32 %v2526_v31, %v767_v0  ;;  %v827_v0 = vrot.slane %v808_v50, %v826_v57 }
 0x351   : > { %v798_v37 = vmul.f32 %v2198_v33, %v791_v32 }
 0x352   : > { %v2528_v34 = vpop.eup %2527 }
 0x353   : > { %v2530_v35 = vpop.eup %2529  ;;  %v793_v40 = vmul.f32 %v2528_v34, %v769_v6  ;;  %v805_v41 = vadd.f32 %v2199_v38, %v798_v37 }
 0x354   : > { %v792_v36 = vmul.f32 %v2530_v35, %v768_v8 }
 0x355   : > { %v800_v44 = vmul.f32 %v2198_v33, %v793_v40 }
 0x356   : > { %v799_v39 = vmul.f32 %v2198_v33, %v792_v36 }
 0x357   : > { %v807_v45 = vadd.f32 %v2199_v38, %v800_v44 }
 0x358   : > { %v806_v42 = vadd.f32 %v2199_v38, %v799_v39 }
 0x359   : > { %v810_v46 = vpack.c.bf16 %v807_v45, %v807_v45  ;;  %v2479_v45 = vld [vmem:[%s3154_s8 + $0x18] sm:$0xff]  }
 0x35a   : > { %v809_v43 = vpack.c.bf16 %v806_v42, %v805_v41 }
 0x35c   : > { %2208 = vmatmul.mubr.msk.bf16.vlgmr.msra.gmra.mxu1 %vm698_vm1, %v809_v43 }
 0x35d   : > { %918 = vmatprep.mubr.bf16.mxu1 %v2629_v17 }
 0x364   : > { %2209 = vmatmul.mubr.msk.bf16.gmra.mxu1 %vm698_vm1, %v810_v46  ;;  %v2480_v46 = vld [vmem:[%s3154_s8 + $0x10] sm:$0xff]  }
 0x41c   : > { %v910_v51 = vpop.f32.mrf.mxu1 }
 0x41d   : > { %v911_v56 = vadd.f32 %v910_v51, %v823_v53 }
 0x41e   : > { %v912_v54 = vpop.f32.mrf.mxu1 }
 0x41f   : > { %v913_v7 = vadd.f32 %v912_v54, %v827_v0 }
 0x420   : > { %v914_v55 = vpop.f32.mrf.mxu1 }
 0x421   : > { %v915_v60 = vadd.f32 %v914_v55, %v823_v53 }
 0x422   : > { %v916_v61 = vpop.f32.mrf.mxu1 }
 0x423   : > { %v929_v62 = vpack.c.bf16 %v915_v60, %v911_v56  ;;  %v917_v3 = vadd.f32 %v916_v61, %v827_v0 }
 0x424   : > { %v920_v63 = vpop.f32.mrf.mxu1 }
 0x425   : > { %v921_v1 = vadd.f32 %v920_v63, %v823_v53  ;;  %933 = vrot.lane.b32.xlu1 %v929_v62, %s2630_s1  ;;  %2350 = vmatprep.mubr.msk.bf16.mxu0 %vm698_vm1, %v929_v62  ;;  %v1042_v10 = vpack.c.bf16 %v917_v3, %v913_v7 }
 0x426   : > { %v922_v2 = vpop.f32.mrf.mxu1 }
 0x427   : > { %v930_v4 = vpack.c.bf16 %v921_v1, %v921_v1  ;;  %v923_v5 = vadd.f32 %v922_v2, %v827_v0  ;;  %v2481_v0 = vld [vmem:[%s3154_s8 + $0x8] sm:$0xff]   ;;  %v2482_v1 = vld [vmem:[%s3154_s8] sm:$0xff]  }
 0x428   : > { %v924_v6 = vpop.f32.mrf.mxu1 }
 0x429   : > { %v1043_v8 = vpack.c.bf16 %v923_v5, %v923_v5  ;;  %935 = vrot.lane.b32.xlu0 %v930_v4, %s2630_s1 }
 0x42a   : > { %v925_v9 = vpop.f32.mrf.mxu1 }
 0x42b   : > { %v1052_v11 = vsel %vm1050_vm2, %v1043_v8, 0  ;;  %2412 = vmatprep.subr.msk.bf16.mxu1 %vm1050_vm2, %v1043_v8  ;;  %v2214_v9 = vld [vmem:[%s3155_s9] ss:$0 sm:$0xff] }
 0x42c   : > { %2355 = vmatpush3.bf16.msra.mxu1 %v1052_v11 }
 0x42d   : > { %2356 = vmatprep.subr.bf16.mxu1 %v1042_v10 }
 0x430   : > { %2357 = vmatpush3.bf16.msra.mxu1 %v1042_v10 }
 0x497   : > { %v934_v14 = vpop.permute.xlu1 %933 }
 0x498   : > { %v944_v15 = vsel %vm698_vm1, %v934_v14, 0 }
 0x49b   : > { %v936_v12 = vpop.permute.xlu0 %935 }
 0x49c   : > { %v947_v13 = vsel %vm698_vm1, %v936_v12, 0  ;;  %2410 = vmatprep.subr.msk.bf16.mxu0 %vm698_vm1, %v936_v12 }
 0x49d   : > { %2347 = vmatpush3.bf16.xpose.msra.mxu0 %v947_v13 }
 0x49e   : > { %2411 = vmatprep.subr.msk.bf16.mxu0 %vm698_vm1, %v934_v14 }
 0x4a5   : > { %2349 = vmatpush3.bf16.xpose.msra.mxu0 %v944_v15 }
 0x4a6   : > { %2362 = vmatprep.subr.bf16.mxu0 %v2479_v45 }
 0x4ac   : > { %2351 = vmatmul.mubr.msk.bf16.vlgmr.msra.gmra.mxu0 %vm698_vm1, %v930_v4 }
 0x4ad   : > { %2363 = vmatpush3.bf16.msra.mxu0 %v2479_v45 }
 0x4ae   : > { %2364 = vmatprep.subr.bf16.mxu0 %v2480_v46 }
 0x4b1   : > { %2365 = vmatpush3.bf16.msra.mxu0 %v2480_v46 }
 0x4b2   : > { %2366 = vmatprep.subr.bf16.mxu0 %v2481_v0 }
 0x4b5   : > { %2367 = vmatpush3.bf16.msra.mxu0 %v2481_v0 }
 0x4b6   : > { %2368 = vmatprep.subr.bf16.mxu0 %v2482_v1 }
 0x4b9   : > { %2369 = vmatpush3.bf16.msra.mxu0 %v2482_v1  ;;  %v2222_v1 = vld [vmem:[%s3150_s4 + $0x5] ss:$0 sm:$0xff] }
 0x56c   : > { %v2352_v20 = vpop.f32.mrf.mxu0 }
 0x56d   : > { %v1005_v28 = vsel %vm1002_vm4, %v2352_v20, -1e+30 }
 0x56e   : > { %v983_v21 = vpop.f32.mrf.mxu0  ;;  %v1013_v29 = vsel %vm1006_vm5, %v1005_v28, -inf }
 0x56f   : > { %v1003_v22 = vsel %vm1002_vm4, %v983_v21, -1e+30 }
 0x570   : > { %v2353_v23 = vpop.f32.mrf.mxu0  ;;  %v1007_v24 = vsel %vm1006_vm5, %v1003_v22, -inf }
 0x571   : > { %1008 = vmax.xlane.f32.xlu1 %v1007_v24 }
 0x572   : > { %v986_v25 = vpop.f32.mrf.mxu0 }
 0x573   : > { %v1004_v26 = vsel %vm1002_vm4, %v986_v25, -1e+30 }
 0x574   : > { %v1010_v27 = vsel %vm1006_vm5, %v1004_v26, -inf }
 0x575   : > { %1011 = vmax.xlane.f32.xlu0 %v1010_v27 }
 0x579   : > { %1014 = vmax.xlane.f32.xlu0 %v1013_v29 }
 0x5fa   : > { %v1009_v30 = vpop.xlane.xlu1 %1008 }
 0x5fb   : > { %v1016_v31 = vsub.f32 %v1003_v22, %v1009_v30 }
 0x5fd   : > { %v1019_v32 = vmul.f32 1.442695, %v1016_v31 }
 0x5fe   : > { %v1012_v33 = vpop.xlane.xlu0 %1011 }
 0x5ff   : > { %2531 = vpow2.f32 %v1019_v32  ;;  %v1017_v34 = vsub.f32 %v1004_v26, %v1012_v33 }
 0x601   : > { %v1021_v35 = vmul.f32 1.442695, %v1017_v34 }
 0x602   : > { %v1015_v36 = vpop.xlane.xlu0 %1014 }
 0x603   : > { %2533 = vpow2.f32 %v1021_v35  ;;  %v1018_v37 = vsub.f32 %v1005_v28, %v1015_v36  ;;  %v2485_v35 = vld [vmem:[%s3156_s10 + $0x34] ss:$8 sps:$4 sm:$0xff]   ;;  %v2483_v36 = vld [vmem:[%s3156_s10 + $0x30] ss:$8 sps:$4 sm:$0xff]  }
 0x604   : > { %1331 = vmatprep.subr.bf16.mxu1 %v2485_v35 }
 0x605   : > { %v1023_v38 = vmul.f32 1.442695, %v1018_v37  ;;  %v2488_v37 = vld [vmem:[%s3156_s10 + $0x24] ss:$8 sps:$4 sm:$0xff]  }
 0x607   : > { %2535 = vpow2.f32 %v1023_v38  ;;  %v2486_v38 = vld [vmem:[%s3156_s10 + $0x20] ss:$8 sps:$4 sm:$0xff]  }
 0x60c   : > { %v2532_v39 = vpop.eup %2531 }
 0x60d   : > { %v1025_v40 = vsel %vm1006_vm5, %v2532_v39, 0.0 }
 0x60e   : > { %1026 = vadd.xlane.f32.xlu1 %v1025_v40  ;;  %v2489_v40 = vld [vmem:[%s3156_s10 + $0x10] ss:$8 sps:$4 sm:$0xff]  }
 0x610   : > { %v2534_v41 = vpop.eup %2533 }
 0x611   : > { %v1028_v42 = vsel %vm1006_vm5, %v2534_v41, 0.0 }
 0x612   : > { %1029 = vadd.xlane.f32.xlu0 %v1028_v42  ;;  %v2492_v42 = vld [vmem:[%s3156_s10] ss:$8 sps:$4 sm:$0xff]  }
 0x614   : > { %v2536_v43 = vpop.eup %2535 }
 0x615   : > { %v1031_v44 = vsel %vm1006_vm5, %v2536_v43, 0.0 }
 0x616   : > { %1032 = vadd.xlane.f32.xlu1 %v1031_v44 }
 0x697   : > { %v1027_v47 = vpop.xlane.xlu1 %1026 }
 0x698   : > { %2537 = vrcp.f32 %v1027_v47 }
 0x69b   : > { %v1030_v50 = vpop.xlane.xlu0 %1029 }
 0x69c   : > { %2539 = vrcp.f32 %v1030_v50 }
 0x69f   : > { %v1033_v51 = vpop.xlane.xlu1 %1032 }
 0x6a0   : > { %2541 = vrcp.f32 %v1033_v51 }
 0x6a5   : > { %v2538_v53 = vpop.eup %2537 }
 0x6a6   : > { %v1037_v55 = vmul.f32 %v2538_v53, %v2532_v39  ;;  %v2491_v39 = vld [vmem:[%s3156_s10 + $0x14] ss:$8 sps:$4 sm:$0xff]  }
 0x6a9   : > { %v2540_v54 = vpop.eup %2539 }
 0x6aa   : > { %v1038_v56 = vmul.f32 %v2540_v54, %v2534_v41  ;;  %v2494_v41 = vld [vmem:[%s3156_s10 + $0x4] ss:$8 sps:$4 sm:$0xff]  }
 0x6ac   : > { %v1040_v60 = vpack.c.bf16 %v1038_v56, %v1037_v55 }
 0x6ad   : > { %v2542_v61 = vpop.eup %2541 }
 0x6ae   : > { %v1039_v62 = vmul.f32 %v2542_v61, %v2536_v43  ;;  %2358 = vmatprep.mubr.msk.bf16.mxu1 %vm1006_vm5, %v1040_v60  ;;  %v2221_v60 = vld [vmem:[%s3150_s4 + $0x4] ss:$0 sm:$0xff] }
 0x6b0   : > { %v1041_v63 = vpack.c.bf16 %v1039_v62, %v1039_v62 }
 0x6b2   : > { %2359 = vmatmul.mubr.msk.bf16.vlgmr.msra.gmra.mxu1 %vm1006_vm5, %v1041_v63 }
 0x6b3   : > { %1355 = vmatprep.mubr.bf16.mxu1 %v2629_v17  ;;  %1332 = vmatpush1.bf16.msra.mxu1 %v2483_v36 }
 0x6b4   : > { %1333 = vmatprep.subr.bf16.mxu1 %v2488_v37 }
 0x6b7   : > { %1334 = vmatpush1.bf16.msra.mxu1 %v2486_v38 }
 0x6b8   : > { %1335 = vmatprep.subr.bf16.mxu1 %v2491_v39 }
 0x6bb   : > { %1336 = vmatpush1.bf16.msra.mxu1 %v2489_v40 }
 0x6bc   : > { %1337 = vmatprep.subr.bf16.mxu1 %v2494_v41 }
 0x6bf   : > { %1338 = vmatpush1.bf16.msra.mxu1 %v2492_v42 }
 0x772   : > { %v2360_v2 = vpop.f32.mrf.mxu1 }
 0x773   : > { %v1104_v7 = vpack.c.bf16 %v2360_v2, %v2360_v2 }
 0x774   : > { %v1088_v3 = vpop.f32.mrf.mxu1 }
 0x776   : > { %v2361_v4 = vpop.f32.mrf.mxu1 }
 0x778   : > { %v1091_v5 = vpop.f32.mrf.mxu1 }
 0x779   : > { %v1103_v6 = vpack.c.bf16 %v1091_v5, %v1088_v3 }
 0x77b   : > { %2370 = vmatprep.mubr.msk.bf16.mxu0 %vm698_vm1, %v1103_v6 }
 0x77c   : > { %2371 = vmatmul.mubr.msk.bf16.vlgmr.msra.gmra.mxu0 %vm698_vm1, %v1104_v7 }
 0x83c   : > { %v2372_v8 = vpop.f32.mrf.mxu0 }
 0x83d   : > { %v1192_v11 = vadd.f32 %v2372_v8, %v2214_v9 }
 0x83e   : > { %v1183_v10 = vpop.f32.mrf.mxu0 }
 0x83f   : > { %v1184_v12 = vadd.f32 %v2214_v9, %v1183_v10  ;;  %v2928_v16 = vadd.f32 %v1192_v11, %v2824_v58  ;;  %v2495_v10 = vld [vmem:[%s3158_s12 + $0x78] sm:$0xff]  }
 0x840   : > { %v2373_v13 = vpop.f32.mrf.mxu0  ;;  %v2496_v11 = vld [vmem:[%s3158_s12 + $0x38] sm:$0xff]   ;;  %2294 = vmatprep.subr.bf16.mxu0 %v2495_v10 }
 0x841   : > { %v2925_v14 = vadd.f32 %v1184_v12, %v2820_v52  ;;  %v1208_v22 = vsel %vm698_vm1, %v2928_v16, 0.0  ;;  %2295 = vmatpush3.bf16.msra.mxu0 %v2496_v11  ;;  %v2497_v12 = vld [vmem:[%s3158_s12 + $0x70] sm:$0xff]   ;;  %v2499_v13 = vld [vmem:[%s3158_s12 + $0x68] sm:$0xff]  }
 0x842   : > { %v1186_v15 = vpop.f32.mrf.mxu0  ;;  %2296 = vmatprep.subr.bf16.mxu0 %v2497_v12 }
 0x843   : > { %v1187_v18 = vadd.f32 %v2214_v9, %v1186_v15  ;;  %v1202_v19 = vsel %vm698_vm1, %v2925_v14, 0.0  ;;  %v2500_v15 = vld [vmem:[%s3158_s12 + $0x28] sm:$0xff]  }
 0x844   : > { %1203 = vadd.xlane.f32.xlu0 %v1202_v19  ;;  %v2502_v19 = vld [vmem:[%s3158_s12 + $0x20] sm:$0xff]  }
 0x845   : > { %v2933_v20 = vadd.f32 %v1187_v18, %v2826_v59  ;;  %v2501_v18 = vld [vmem:[%s3158_s12 + $0x60] sm:$0xff]  }
 0x847   : > { %v1205_v21 = vsel %vm698_vm1, %v2933_v20, 0.0 }
 0x848   : > { %1206 = vadd.xlane.f32.xlu1 %v1205_v21  ;;  %1209 = vadd.xlane.f32.xlu0 %v1208_v22  ;;  %v2503_v21 = vld [vmem:[%s3158_s12 + $0x58] sm:$0xff]  }
 0x849   : > { %v2504_v22 = vld [vmem:[%s3158_s12 + $0x18] sm:$0xff]  }
 0x8cd   : > { %v1204_v52 = vpop.xlane.xlu0 %1203 }
 0x8ce   : > { %v1211_v23 = vmul.f32 0.015625, %v1204_v52  ;;  %v2505_v52 = vld [vmem:[%s3158_s12 + $0x50] sm:$0xff]  }
 0x8d0   : > { %v1214_v58 = vsub.f32 %v2925_v14, %v1211_v23  ;;  %v2506_v23 = vld [vmem:[%s3158_s12 + $0x10] sm:$0xff]  }
 0x8d1   : > { %v1207_v24 = vpop.xlane.xlu1 %1206  ;;  %v1210_v25 = vpop.xlane.xlu0 %1209 }
 0x8d2   : > { %v1212_v26 = vmul.f32 0.015625, %v1207_v24  ;;  %v1213_v27 = vmul.f32 0.015625, %v1210_v25  ;;  %v1217_v28 = vmul.f32 %v1214_v58, %v1214_v58  ;;  %v2508_v24 = vld [vmem:[%s3158_s12 + $0x8] sm:$0xff]   ;;  %v2509_v25 = vld [vmem:[%s3158_s12 + $0x40] sm:$0xff]  }
 0x8d4   : > { %v1215_v59 = vsub.f32 %v2933_v20, %v1212_v26  ;;  %v1216_v29 = vsub.f32 %v2928_v16, %v1213_v27  ;;  %v1220_v30 = vsel %vm698_vm1, %v1217_v28, 0.0  ;;  %v2510_v26 = vld [vmem:[%s3158_s12] sm:$0xff]  }
 0x8d5   : > { %1221 = vadd.xlane.f32.xlu1 %v1220_v30  ;;  %v1255_v27 = vld [vmem:[%s3157_s11] sm:$0x3] }
 0x8d6   : > { %v1218_v31 = vmul.f32 %v1215_v59, %v1215_v59  ;;  %v1219_v32 = vmul.f32 %v1216_v29, %v1216_v29  ;;  %v1270_v28 = vrot.slane %v1255_v27, %v2877_v49 }
 0x8d8   : > { %v1223_v33 = vsel %vm698_vm1, %v1218_v31, 0.0  ;;  %v1226_v34 = vsel %vm698_vm1, %v1219_v32, 0.0 }
 0x8d9   : > { %1224 = vadd.xlane.f32.xlu0 %v1223_v33  ;;  %1227 = vadd.xlane.f32.xlu1 %v1226_v34 }
 0x95e   : > { %v1222_v43 = vpop.xlane.xlu1 %1221 }
 0x95f   : > { %v1229_v44 = vmul.f32 0.015625, %v1222_v43 }
 0x961   : > { %v1232_v45 = vadd.f32 1e-05, %v1229_v44 }
 0x962   : > { %v1228_v46 = vpop.xlane.xlu1 %1227  ;;  %v1225_v47 = vpop.xlane.xlu0 %1224 }
 0x963   : > { %2543 = vrsqrt.f32 %v1232_v45  ;;  %v1231_v50 = vmul.f32 0.015625, %v1228_v46  ;;  %v1230_v51 = vmul.f32 0.015625, %v1225_v47 }
 0x965   : > { %v1234_v53 = vadd.f32 1e-05, %v1231_v50  ;;  %v1233_v54 = vadd.f32 1e-05, %v1230_v51 }
 0x967   : > { %2545 = vrsqrt.f32 %v1234_v53 }
 0x968   : > { %2547 = vrsqrt.f32 %v1233_v54 }
 0x970   : > { %v2544_v55 = vpop.eup %2543 }
 0x971   : > { %v1238_v56 = vmul.f32 %v2544_v55, %v1214_v58  ;;  %v2507_v58 = vld [vmem:[%s3158_s12 + $0x48] sm:$0xff]  }
 0x973   : > { %v1245_v0 = vmul.f32 %v2221_v60, %v1238_v56 }
 0x974   : > { %v2546_v61 = vpop.eup %2545 }
 0x975   : > { %v2548_v62 = vpop.eup %2547  ;;  %v1240_v3 = vmul.f32 %v2546_v61, %v1216_v29  ;;  %v1252_v4 = vadd.f32 %v2222_v1, %v1245_v0 }
 0x976   : > { %v1239_v63 = vmul.f32 %v2548_v62, %v1215_v59  ;;  %v1274_v59 = vrot.slane %v1255_v27, %v826_v57 }
 0x977   : > { %v1247_v7 = vmul.f32 %v2221_v60, %v1240_v3 }
 0x978   : > { %v1246_v2 = vmul.f32 %v2221_v60, %v1239_v63 }
 0x979   : > { %v1254_v8 = vadd.f32 %v2222_v1, %v1247_v7 }
 0x97a   : > { %v1253_v5 = vadd.f32 %v2222_v1, %v1246_v2 }
 0x97b   : > { %v1257_v9 = vpack.c.bf16 %v1254_v8, %v1254_v8 }
 0x97c   : > { %v1256_v6 = vpack.c.bf16 %v1253_v5, %v1252_v4 }
 0x97e   : > { %2231 = vmatmul.mubr.msk.bf16.vlgmr.msra.gmra.mxu1 %vm698_vm1, %v1256_v6 }
 0x97f   : > { %1365 = vmatprep.mubr.bf16.mxu1 %v2629_v17  ;;  %v2498_v17 = vld [vmem:[%s3158_s12 + $0x30] sm:$0xff]  }
 0x980   : > { %2297 = vmatpush3.bf16.msra.mxu0 %v2498_v17 }
 0x981   : > { %2298 = vmatprep.subr.bf16.mxu0 %v2499_v13 }
 0x984   : > { %2299 = vmatpush3.bf16.msra.mxu0 %v2500_v15 }
 0x985   : > { %2300 = vmatprep.subr.bf16.mxu0 %v2501_v18 }
 0x986   : > { %2232 = vmatmul.mubr.msk.bf16.gmra.mxu1 %vm698_vm1, %v1257_v9 }
 0x988   : > { %2301 = vmatpush3.bf16.msra.mxu0 %v2502_v19 }
 0x989   : > { %2302 = vmatprep.subr.bf16.mxu0 %v2503_v21 }
 0x98c   : > { %2303 = vmatpush3.bf16.msra.mxu0 %v2504_v22 }
 0x98d   : > { %2304 = vmatprep.subr.bf16.mxu0 %v2505_v52 }
 0x990   : > { %2305 = vmatpush3.bf16.msra.mxu0 %v2506_v23 }
 0x991   : > { %2306 = vmatprep.subr.bf16.mxu0 %v2507_v58 }
 0x994   : > { %2307 = vmatpush3.bf16.msra.mxu0 %v2508_v24 }
 0x995   : > { %2308 = vmatprep.subr.bf16.mxu0 %v2509_v25 }
 0x998   : > { %2309 = vmatpush3.bf16.msra.mxu0 %v2510_v26 }
 0xa3e   : > { %v1357_v29 = vpop.f32.mrf.mxu1 }
 0xa3f   : > { %v3032_v30 = vadd.f32 %v1357_v29, %v1270_v28 }
 0xa40   : > { %v1359_v31 = vpop.f32.mrf.mxu1 }
 0xa41   : > { %v1374_v32 = vmul.f32 %v3032_v30, %v3032_v30  ;;  %v1360_v33 = vadd.f32 %v1359_v31, %v1274_v59 }
 0xa42   : > { %v1361_v34 = vpop.f32.mrf.mxu1 }
 0xa43   : > { %v1380_v35 = vmul.f32 %v1374_v32, %v3032_v30  ;;  %v1375_v36 = vmul.f32 %v1360_v33, %v1360_v33  ;;  %v1362_v37 = vadd.f32 %v1361_v34, %v1270_v28 }
 0xa44   : > { %v1363_v38 = vpop.f32.mrf.mxu1 }
 0xa45   : > { %v1386_v39 = vmul.f32 0.044715, %v1380_v35  ;;  %v1381_v40 = vmul.f32 %v1375_v36, %v1360_v33  ;;  %v1376_v49 = vmul.f32 %v1362_v37, %v1362_v37  ;;  %v1364_v41 = vadd.f32 %v1363_v38, %v1274_v59 }
 0xa46   : > { %v1367_v48 = vpop.f32.mrf.mxu1 }
 0xa47   : > { %v1392_v57 = vadd.f32 %v1386_v39, %v3032_v30  ;;  %v1387_v42 = vmul.f32 0.044715, %v1381_v40  ;;  %v1382_v43 = vmul.f32 %v1376_v49, %v1362_v37  ;;  %v1377_v44 = vmul.f32 %v1364_v41, %v1364_v41 }
 0xa48   : > { %v1368_v45 = vadd.f32 %v1367_v48, %v1270_v28  ;;  %v1369_v46 = vpop.f32.mrf.mxu1 }
 0xa49   : > { %v1398_v47 = vmul.f32 0.7978846, %v1392_v57  ;;  %v1393_v50 = vadd.f32 %v1387_v42, %v1360_v33  ;;  %v1388_v51 = vmul.f32 0.044715, %v1382_v43  ;;  %v1383_v53 = vmul.f32 %v1377_v44, %v1364_v41 }
 0xa4a   : > { %v1378_v54 = vmul.f32 %v1368_v45, %v1368_v45  ;;  %v1370_v55 = vadd.f32 %v1369_v46, %v1274_v59  ;;  %v1371_v56 = vpop.f32.mrf.mxu1 }
 0xa4b   : > { %v1399_v60 = vmul.f32 0.7978846, %v1393_v50  ;;  %v1394_v61 = vadd.f32 %v1388_v51, %v1362_v37  ;;  %v1389_v62 = vmul.f32 0.044715, %v1383_v53  ;;  %2549 = vtanh.f32 %v1398_v47 }
 0xa4c   : > { %v1384_v63 = vmul.f32 %v1378_v54, %v1368_v45  ;;  %v1379_v0 = vmul.f32 %v1370_v55, %v1370_v55  ;;  %v1372_v1 = vpop.f32.mrf.mxu1 }
 0xa4d   : > { %2551 = vtanh.f32 %v1399_v60  ;;  %v1400_v2 = vmul.f32 0.7978846, %v1394_v61  ;;  %v1395_v3 = vadd.f32 %v1389_v62, %v1364_v41 }
 0xa4e   : > { %v1390_v4 = vmul.f32 0.044715, %v1384_v63  ;;  %v1385_v5 = vmul.f32 %v1379_v0, %v1370_v55 }
 0xa4f   : > { %2553 = vtanh.f32 %v1400_v2  ;;  %v1401_v6 = vmul.f32 0.7978846, %v1395_v3 }
 0xa50   : > { %v1396_v7 = vadd.f32 %v1390_v4, %v1368_v45  ;;  %v1391_v8 = vmul.f32 0.044715, %v1385_v5 }
 0xa51   : > { %2555 = vtanh.f32 %v1401_v6 }
 0xa52   : > { %v1402_v9 = vmul.f32 0.7978846, %v1396_v7  ;;  %v1397_v10 = vadd.f32 %v1391_v8, %v1370_v55 }
 0xa54   : > { %2557 = vtanh.f32 %v1402_v9  ;;  %v1403_v11 = vmul.f32 0.7978846, %v1397_v10 }
 0xa56   : > { %2559 = vtanh.f32 %v1403_v11 }
 0xa58   : > { %v2550_v12 = vpop.eup %2549 }
 0xa59   : > { %v1410_v18 = vadd.f32 1.0, %v2550_v12  ;;  %v2511_v12 = vld [vmem:[%s3160_s14 + $0x18] sm:$0xff]  }
 0xa5a   : > { %v2552_v17 = vpop.eup %2551  ;;  %2374 = vmatprep.subr.bf16.mxu1 %v2511_v12 }
 0xa5b   : > { %v1411_v13 = vadd.f32 1.0, %v2552_v17  ;;  %v1416_v58 = vmul.f32 0.5, %v1410_v18  ;;  %2375 = vmatpush3.bf16.msra.mxu1 %v2511_v12  ;;  %v2512_v17 = vld [vmem:[%s3160_s14 + $0x10] sm:$0xff]   ;;  %v1762_v18 = vld [vmem:[%s607_s26] sm:$0xff] }
 0xa5c   : > { %v2554_v15 = vpop.eup %2553  ;;  %2376 = vmatprep.subr.bf16.mxu1 %v2512_v17 }
 0xa5d   : > { %v1412_v19 = vadd.f32 1.0, %v2554_v15  ;;  %v1417_v23 = vmul.f32 0.5, %v1411_v13  ;;  %v1422_v31 = vmul.f32 %v1416_v58, %v3032_v30  ;;  %v2513_v13 = vld [vmem:[%s3160_s14 + $0x8] sm:$0xff]   ;;  %v2514_v15 = vld [vmem:[%s3160_s14] sm:$0xff]  }
 0xa5e   : > { %v2556_v21 = vpop.eup %2555 }
 0xa5f   : > { %v1418_v22 = vmul.f32 0.5, %v1412_v19  ;;  %v1413_v52 = vadd.f32 1.0, %v2556_v21  ;;  %v1423_v59 = vmul.f32 %v1417_v23, %v1360_v33  ;;  %v2233_v33 = vld [vmem:[%s3159_s13] ss:$0 sm:$0xff]  ;;  %2377 = vmatpush3.bf16.msra.mxu1 %v2512_v17  ;;  %v1763_v19 = vld [vmem:[%s607_s26 + $0x8] sm:$0xff]  ;;  %s2635_s26 = smov 80  }
 0xa60   : > { %2378 = vmatprep.subr.bf16.mxu1 %v2513_v13 }
 0xa61   : > { %v2558_v24 = vpop.eup %2557  ;;  %v1419_v25 = vmul.f32 0.5, %v1413_v52  ;;  %v1424_v26 = vmul.f32 %v1418_v22, %v1362_v37 }
 0xa62   : > { %v1414_v27 = vadd.f32 1.0, %v2558_v24 }
 0xa63   : > { %v2560_v28 = vpop.eup %2559  ;;  %v1425_v29 = vmul.f32 %v1419_v25, %v1364_v41  ;;  %v1429_v35 = vpack.c.bf16 %v1424_v26, %v1422_v31  ;;  %2379 = vmatpush3.bf16.msra.mxu1 %v2513_v13 }
 0xa64   : > { %v1415_v32 = vadd.f32 1.0, %v2560_v28  ;;  %v1420_v38 = vmul.f32 0.5, %v1414_v27  ;;  %2380 = vmatprep.subr.bf16.mxu1 %v2514_v15 }
 0xa65   : > { %v1430_v34 = vpack.c.bf16 %v1425_v29, %v1423_v59  ;;  %v2250_v29 = vld [vmem:[%s3150_s4 + $0x6] ss:$0 sm:$0xff] }
 0xa66   : > { %v1421_v36 = vmul.f32 0.5, %v1415_v32  ;;  %v1426_v49 = vmul.f32 %v1420_v38, %v1368_v45 }
 0xa67   : > { %1599 = vmatprep.mubr.bf16.mxu0 %v1430_v34  ;;  %2381 = vmatpush3.bf16.msra.mxu1 %v2514_v15 }
 0xa68   : > { %1600 = vmatmul.mubr.bf16.vlgmr.msra.gmra.mxu0 %v1429_v35  ;;  %v1427_v39 = vmul.f32 %v1421_v36, %v1370_v55  ;;  %v1431_v48 = vpack.c.bf16 %v1426_v49, %v1426_v49  ;;  %v2251_v35 = vld [vmem:[%s3150_s4 + $0x7] ss:$0 sm:$0xff] }
 0xa6a   : > { %v1432_v40 = vpack.c.bf16 %v1427_v39, %v1427_v39 }
 0xa6c   : > { %1607 = vmatprep.mubr.bf16.mxu0 %v1432_v40 }
 0xa70   : > { %1608 = vmatmul.mubr.bf16.gmra.mxu0 %v1431_v48 }
 0xb28   : > { %v2310_v37 = vpop.f32.mrf.mxu0 }
 0xb2a   : > { %v2311_v41 = vpop.f32.mrf.mxu0 }
 0xb2b   : > { %v2312_v30 = vadd.f32 %v2311_v41, %v2310_v37 }
 0xb2c   : > { %v2313_v57 = vpop.f32.mrf.mxu0 }
 0xb2d   : > { %v1602_v42 = vadd.f32 %v2312_v30, %v2233_v33 }
 0xb2e   : > { %v2314_v43 = vpop.f32.mrf.mxu0 }
 0xb2f   : > { %v2315_v44 = vadd.f32 %v2314_v43, %v2313_v57  ;;  %v1615_v46 = vadd.f32 %v1602_v42, %v2925_v14  ;;  %v2258_v57 = vld [vmem:[%s3161_s15] ss:$0 sm:$0xff] }
 0xb30   : > { %v2316_v47 = vpop.f32.mrf.mxu0 }
 0xb31   : > { %v1605_v50 = vadd.f32 %v2315_v44, %v2233_v33  ;;  %v1620_v45 = vsel %vm698_vm1, %v1615_v46, 0.0 }
 0xb32   : > { %v2317_v51 = vpop.f32.mrf.mxu0  ;;  %1621 = vadd.xlane.f32.xlu0 %v1620_v45 }
 0xb33   : > { %v2318_v53 = vadd.f32 %v2317_v51, %v2316_v47  ;;  %v1616_v54 = vadd.f32 %v1605_v50, %v2933_v20 }
 0xb34   : > { %v2319_v55 = vpop.f32.mrf.mxu0 }
 0xb35   : > { %v1610_v56 = vadd.f32 %v2318_v53, %v2233_v33  ;;  %v1623_v60 = vsel %vm698_vm1, %v1616_v54, 0.0 }
 0xb36   : > { %v2320_v61 = vpop.f32.mrf.mxu0  ;;  %1624 = vadd.xlane.f32.xlu1 %v1623_v60  ;;  %v2631_v60 = vmov 0.0  }
 0xb37   : > { %v1617_v62 = vadd.f32 %v1610_v56, %v2928_v16  ;;  %2386 = vmatprep.subr.bf16.mxu1 %v2631_v60  ;;  %2404 = vmatprep.subr.bf16.mxu0 %v2631_v60 }
 0xb38   : > { %2406 = vmatprep.mubr.msk.bf16.mxu0 %vm2632_vm6, %v2631_v60 }
 0xb39   : > { %v1626_v63 = vsel %vm698_vm1, %v1617_v62, 0.0 }
 0xb3a   : > { %1627 = vadd.xlane.f32.xlu0 %v1626_v63 }
 0xbbb   : > { %v1622_v14 = vpop.xlane.xlu0 %1621 }
 0xbbc   : > { %v1629_v0 = vmul.f32 0.015625, %v1622_v14 }
 0xbbe   : > { %v1632_v1 = vsub.f32 %v1615_v46, %v1629_v0 }
 0xbbf   : > { %v1625_v2 = vpop.xlane.xlu1 %1624 }
 0xbc0   : > { %v1630_v3 = vmul.f32 0.015625, %v1625_v2  ;;  %v1635_v4 = vmul.f32 %v1632_v1, %v1632_v1 }
 0xbc2   : > { %v1633_v5 = vsub.f32 %v1616_v54, %v1630_v3  ;;  %v1638_v20 = vsel %vm698_vm1, %v1635_v4, 0.0  ;;  %v2515_v54 = vld [vmem:[%s3162_s16] sm:$0xff]   ;;  %v2518_v3 = vld [vmem:[%s3162_s16 + $0x10] sm:$0xff]  }
 0xbc3   : > { %1639 = vadd.xlane.f32.xlu1 %v1638_v20  ;;  %v1628_v6 = vpop.xlane.xlu0 %1627 }
 0xbc4   : > { %v1631_v7 = vmul.f32 0.015625, %v1628_v6  ;;  %v1636_v8 = vmul.f32 %v1633_v5, %v1633_v5 }
 0xbc6   : > { %v1634_v9 = vsub.f32 %v1617_v62, %v1631_v7  ;;  %v1641_v10 = vsel %vm698_vm1, %v1636_v8, 0.0  ;;  %v2517_v62 = vld [vmem:[%s3162_s16 + $0x18] sm:$0xff]  }
 0xbc7   : > { %1642 = vadd.xlane.f32.xlu0 %v1641_v10  ;;  %2405 = vmatpush3.bf16.msra.mxu0 %v2517_v62 }
 0xbc8   : > { %v1637_v16 = vmul.f32 %v1634_v9, %v1634_v9 }
 0xbca   : > { %v1644_v11 = vsel %vm698_vm1, %v1637_v16, 0.0  ;;  %v2261_v16 = vld [vmem:[%s3163_s17] ss:$0 sm:$0xff] }
 0xbcb   : > { %1645 = vadd.xlane.f32.xlu1 %v1644_v11 }
 0xbdc   : > { %1779 = vperm.xlu1 %2463, %v1763_v19  }
 0xbdd   : > { %1774 = vperm.xlu0 %2462, %v1762_v18  }
 0xc4c   : > { %v1640_v21 = vpop.xlane.xlu1 %1639 }
 0xc4d   : > { %v1647_v22 = vmul.f32 0.015625, %v1640_v21 }
 0xc4f   : > { %v1650_v52 = vadd.f32 1e-05, %v1647_v22 }
 0xc50   : > { %v1643_v23 = vpop.xlane.xlu0 %1642 }
 0xc51   : > { %2561 = vrsqrt.f32 %v1650_v52  ;;  %v1648_v58 = vmul.f32 0.015625, %v1643_v23 }
 0xc53   : > { %v1651_v24 = vadd.f32 1e-05, %v1648_v58 }
 0xc54   : > { %v1646_v25 = vpop.xlane.xlu1 %1645 }
 0xc55   : > { %2563 = vrsqrt.f32 %v1651_v24  ;;  %v1649_v26 = vmul.f32 0.015625, %v1646_v25 }
 0xc57   : > { %v1652_v27 = vadd.f32 1e-05, %v1649_v26 }
 0xc58   : > { %v1775_v46 = vpop.permute.xlu0 %1774  ;;  %v1780_v50 = vpop.permute.xlu1 %1779 }
 0xc59   : > { %2565 = vrsqrt.f32 %v1652_v27 }
 0xc5e   : > { %v2562_v28 = vpop.eup %2561 }
 0xc5f   : > { %v1656_v59 = vmul.f32 %v2562_v28, %v1632_v1  ;;  %v2516_v1 = vld [vmem:[%s3162_s16 + $0x8] sm:$0xff]  }
 0xc61   : > { %v1663_v34 = vmul.f32 %v2250_v29, %v1656_v59 }
 0xc62   : > { %v2564_v31 = vpop.eup %2563 }
 0xc63   : > { %v1657_v32 = vmul.f32 %v2564_v31, %v1633_v5  ;;  %v1670_v40 = vadd.f32 %v2251_v35, %v1663_v34 }
 0xc65   : > { %v1664_v36 = vmul.f32 %v2250_v29, %v1657_v32 }
 0xc66   : > { %v2566_v38 = vpop.eup %2565 }
 0xc67   : > { %v1658_v39 = vmul.f32 %v2566_v38, %v1634_v9  ;;  %v1671_v49 = vadd.f32 %v2251_v35, %v1664_v36 }
 0xc69   : > { %v1665_v48 = vmul.f32 %v2250_v29, %v1658_v39  ;;  %v1673_v37 = vpack.c.bf16 %v1671_v49, %v1670_v40 }
 0xc6b   : > { %v1672_v33 = vadd.f32 %v2251_v35, %v1665_v48  ;;  %2382 = vmatprep.mubr.msk.bf16.mxu1 %vm698_vm1, %v1673_v37 }
 0xc6d   : > { %v1674_v41 = vpack.c.bf16 %v1672_v33, %v1672_v33 }
 0xc6f   : > { %2383 = vmatmul.mubr.msk.bf16.vlgmr.msra.gmra.mxu1 %vm698_vm1, %v1674_v41 }
 0xc70   : > { %2388 = vmatprep.mubr.msk.bf16.mxu1 %vm2632_vm6, %v2631_v60  ;;  %2387 = vmatpush3.bf16.msra.mxu1 %v2515_v54 }
 0xc71   : > { %2392 = vmatprep.subr.bf16.mxu1 %v2631_v60 }
 0xd2f   : > { %v2384_v30 = vpop.f32.mrf.mxu1 }
 0xd31   : > { %v1747_v42 = vpop.f32.mrf.mxu1 }
 0xd32   : > { %v1770_v43 = vsub.f32 %v1747_v42, %v2258_v57 }
 0xd33   : > { %v2385_v44 = vpop.f32.mrf.mxu1 }
 0xd34   : > { %v1782_v45 = vmul.f32 %v1775_v46, %v1770_v43 }
 0xd35   : > { %v1750_v47 = vpop.f32.mrf.mxu1 }
 0xd36   : > { %v1771_v51 = vsub.f32 %v1750_v47, %v2258_v57  ;;  %v1784_v55 = vadd.f32 %v2258_v57, %v1782_v45 }
 0xd38   : > { %v1783_v53 = vmul.f32 %v1780_v50, %v1771_v51 }
 0xd3a   : > { %v1785_v56 = vadd.f32 %v2258_v57, %v1783_v53 }
 0xd3c   : > { %v1786_v61 = vpack.c.bf16 %v1785_v56, %v1784_v55 }
 0xd3e   : > { %1867 = vrot.lane.b32.xlu1 %v1786_v61, %s2633_s3  ;;  %s592_s3 = sand.u32 1, %s2619_s28  }
 0xd3f   : > { %s3106_s1 = scalar_lea.sflag [#allocation3], %s592_s3 }
 0xd42   : > { %1940 = vrot.lane.b32.xlu1 %v1786_v61, %s2634_s25  ;;  %s2187_s25 = sshll.u32 %s592_s3, 4 }
 0xd46   : > { %2013 = vrot.lane.b32.xlu1 %v1786_v61, %s2635_s26  ;;  %s594_s26 = scalar_lea.vmem [#allocation2], %s2187_s25  ;;  %s2573_s25 = scalar_lea.vmem %s2572_s24, 512 }
 0xd47   : > { %s2100_s20 = sshll.u32 %s594_s26, 4  ;;  %s3099_s20 = int_to_ptr.vmem [resolvable:$true] %s2100_s20 }
 0xd48   : > { %s2567_s23 = scalar_lea.vmem %s3099_s20, 256  ;;  %p2574_p0 = scmp.lt.s32.totalorder %s3099_s20, %s2572_s24 }
 0xd49   : > { %p2568_p11 = scmp.ne.s32.totalorder %s3099_s20, %s2567_s23  ;;  %p2575_p1 = scmp.lt.s32.totalorder %s2573_s25, %s2567_s23 }
 0xd4b   : > { %p2569_p12 = pnand %p2568_p11, %p2772_p5  ;;  %p2576_p2 = por %p2575_p1, %p2574_p0 }
 0xd4d   : > { %p2570_p13 = pneg %p2569_p12 }
 0xd4f   : > { %p2577_p3 = pnand %p2576_p2, %p2570_p13 }
 0xd69   : > { %1789 = vxpose.xlu1.c.b16.start.end [1/1] (short) (narrow) %v1786_v61, 16 }
 0xdb0   : > { %v1868_v63 = vpop.permute.xlu1 %1867 }
 0xdb1   : > { %1870 = vxpose.xlu0.c.b16.start.end [1/1] (short) (narrow) %v1868_v63, 16 }
 0xdb4   : > { %v1941_v14 = vpop.permute.xlu1 %1940 }
 0xdb5   : > { %1943 = vxpose.xlu1.c.b16.start.end [1/1] (short) (narrow) %v1941_v14, 16 }
 0xdb8   : > { %v2014_v0 = vpop.permute.xlu1 %2013 }
 0xdb9   : > { %2016 = vxpose.xlu1.c.b16.start.end [1/1] (short) (narrow) %v2014_v0, 16 }
 0xdcb   : > { %v1797_v2 = vpop.trf.xlu1 }
 0xdcc   : > { %2389 = vmatmul.mubr.msk.bf16.vlgmr.msra.gmra.mxu1 %vm1811_vm7, %v1797_v2 }
 0xdcd   : > { %2393 = vmatpush3.bf16.msra.mxu1 %v2516_v1  ;;  %2394 = vmatprep.mubr.msk.bf16.mxu1 %vm2632_vm6, %v2631_v60 }
 0xdce   : > { %2398 = vmatprep.subr.bf16.mxu1 %v2631_v60 }
 0xe13   : > { %v1878_v4 = vpop.trf.xlu0 }
 0xe14   : > { %2395 = vmatmul.mubr.msk.bf16.vlgmr.msra.gmra.mxu1 %vm1811_vm7, %v1878_v4 }
 0xe15   : > { %2399 = vmatpush3.bf16.msra.mxu1 %v2518_v3  ;;  %2400 = vmatprep.mubr.msk.bf16.mxu1 %vm2632_vm6, %v2631_v60 }
 0xe17   : > { %v1951_v5 = vpop.trf.xlu1 }
 0xe1b   : > { %v2024_v20 = vpop.trf.xlu1 }
 0xe1c   : > { %2401 = vmatmul.mubr.msk.bf16.vlgmr.msra.gmra.mxu1 %vm1811_vm7, %v1951_v5  ;;  %2407 = vmatmul.mubr.msk.bf16.vlgmr.msra.gmra.mxu0 %vm1811_vm7, %v2024_v20 }
 0xe8c   : > { %v1849_v6 = vpop.f32.mrf.mxu1 }
 0xe8d   : > { %v1862_v17 = vadd.f32 %v2261_v16, %v1849_v6 }
 0xe8e   : > { %v2390_v7 = vpop.f32.mrf.mxu1 }
 0xe90   : > { %v1852_v8 = vpop.f32.mrf.mxu1 }
 0xe91   : > { %v1863_v21 = vadd.f32 %v2261_v16, %v1852_v8 }
 0xe92   : > { %v2391_v9 = vpop.f32.mrf.mxu1 }
 0xed4   : > { %v1929_v10 = vpop.f32.mrf.mxu1 }
 0xed5   : > { %v1936_v15 = vadd.f32 %v1929_v10, %v1862_v17 }
 0xed6   : > { %v2396_v11 = vpop.f32.mrf.mxu1 }
 0xed8   : > { %v1932_v12 = vpop.f32.mrf.mxu1 }
 0xed9   : > { %v1937_v58 = vadd.f32 %v1932_v12, %v1863_v21 }
 0xeda   : > { %v2397_v13 = vpop.f32.mrf.mxu1 }
 0xedc   : > { %v2002_v18 = vpop.f32.mrf.mxu1  ;;  %v2075_v19 = vpop.f32.mrf.mxu0 }
 0xedd   : > { %v2009_v22 = vadd.f32 %v2002_v18, %v1936_v15 }
 0xede   : > { %v2402_v52 = vpop.f32.mrf.mxu1  ;;  %v2408_v23 = vpop.f32.mrf.mxu0 }
 0xedf   : > { %v2082_v24 = vadd.f32 %v2075_v19, %v2009_v22 }
 0xee0   : > { %v2005_v25 = vpop.f32.mrf.mxu1  ;;  %v2078_v26 = vpop.f32.mrf.mxu0 }
 0xee1   : > { %2084 = vst [vmem:[%s594_s26] sm:$0xff] %v2082_v24  ;;  %v2010_v27 = vadd.f32 %v2005_v25, %v1937_v58 }
 0xee2   : > { %v2403_v28 = vpop.f32.mrf.mxu1  ;;  %v2409_v59 = vpop.f32.mrf.mxu0 }
 0xee3   : > { %v2083_v29 = vadd.f32 %v2078_v26, %v2010_v27 }
 0xee5   : > { %2085 = vst [vmem:[%s594_s26 + $0x8] sm:$0xff] %v2083_v29 }
 0xee6   : > { %2580 = shalt.err (!%p2577_p3)
}
 0xee7   : > { %s2581_s3 = scalar_lea.hbm %s3104_s29, 256  ;;  %s2585_s19 = scalar_lea.hbm %s3164_s18, 512 }
 0xee8   : > { %p2582_p4 = scmp.ne.s32.totalorder %s3104_s29, %s2581_s3  ;;  %p2586_p9 = scmp.lt.s32.totalorder %s3104_s29, %s3164_s18 }
 0xee9   : > { %p2587_p10 = scmp.lt.s32.totalorder %s2585_s19, %s2581_s3 }
 0xeea   : > { %p2583_p7 = pnand %p2582_p4, %p2772_p5 }
 0xeeb   : > { %p2588_p11 = por %p2587_p10, %p2586_p9 }
 0xeec   : > { %p2584_p8 = pneg %p2583_p7 }
 0xeee   : > { %p2589_p12 = pnand %p2588_p11, %p2584_p8 }
 0xef0   : > { %2592 = shalt.err (!%p2589_p12)
}
 0xef1   : > { %s2637_s23 = smov 128   ;;  %s2638_s24 = smov 8  }
 0xef2   : > { %2414 = dma.vmem_to_hbm [thread:$0]  (%p2772_p5), %s3099_s20, 256, %s3104_s29, %s3106_s1, %s2637_s23, %s2637_s23, %s2638_s24  }
 0xef3 PF: > { %p2420_p13 = scmp.ge.s32.totalorder %s2627_s30, 2  ;;  %s2115_s26 = sand.u32 1, %s2615_s27  }
 0xef4   : > { %s2116_s3 = scalar_lea.sflag [#allocation3], %s2115_s26 }
 0xef5   : > { %p2417_p0 = pnand %p2420_p13, %p2776_p6 }
 0xef7   : > { %p2418_p1 = pneg %p2417_p0 }
 0xef9   : > { %2610 = dma.done.wait (%p2418_p1), %s2116_s3, 256  }
 0xefa   : > { %2612 = vsyncadd (%p2418_p1), %s2116_s3, 4294967040  ;;  %s3184_s30 = sld [smem:[#allocation6_spill]]  ;;  %s3187_s27 = smov %s2619_s28 }
 0xefb   : > { %s3185_s22 = sld [smem:[#allocation5_spill]] }
 0xefc   : > { %s3186_s29 = sld [smem:[#allocation7_spill]] }
 0xf00   : > { %p28_p2 = scmp.ge.s32.totalorder %s3184_s30, 4  }
 0xf01   : > { %s3188_s28 = smov %s3185_s22 }
 0xf02   :  { %30 = sbr.rel (!%p28_p2) target bundleno = 8 (0x8), region = 133 }
 0xf07   :  { %2121 = vsyncpa [#allocation3], 1 }
 0xf08   :  { %2123 = vsyncpa [#allocation3 + $0x1], 1 }

</bundles_post_ra>
